<compile_context>
chip_gen: v7x
topology: tpu7x:2x2x1
jax: 0.10.0
libtpu: 0.0.40
codegen_flags: <defaults>
</compile_context>

<pallas_src>
import functools

import jax
import jax.numpy as jnp
from jax.experimental import pallas as pl
from jax.experimental.pallas import tpu as pltpu

LEAKY_SLOPE = 0.2          # nn.LeakyReLU(0.2)
IN_EPS = 1e-5              # nn.InstanceNorm2d default (affine=False, biased var)
LANE = 128
TM_MAX = 512
TN_MAX = 256
TK_CANDIDATES = (2048, 1024, 512, 256, 128)
A_TILE_BYTES_BUDGET = 8 * 1024 * 1024     # per-buffer A tile budget (bf16 bytes)


def _round_up(x, m):
    return (x + m - 1) // m * m


_VMEM_LIMIT_CACHE = [None]


def _vmem_limit():
    """Generation-aware scoped-VMEM limit (v7x: 64 MiB physical, v5e/v6e: 128)."""
    if _VMEM_LIMIT_CACHE[0] is None:
        cap = 64 * 2 ** 20
        try:
            info = pltpu.get_tpu_info()
            cap = int(getattr(info, "vmem_capacity_bytes", cap) or cap)
        except Exception:
            pass
        _VMEM_LIMIT_CACHE[0] = int(max(32 * 2 ** 20,
                                       min(cap - 16 * 2 ** 20, 100 * 2 ** 20)))
    return _VMEM_LIMIT_CACHE[0]


def _pad_tile_m(M):
    """Mp % tm == 0, tm % 8 == 0; prefer >=2 M tiles so both v7x cores get work."""
    if M >= 2 * TM_MAX:
        return _round_up(M, TM_MAX), TM_MAX
    Mp = _round_up(M, 16)
    if (Mp // 2) % 8 == 0 and Mp // 2 > 0:
        return Mp, Mp // 2
    Mp = _round_up(M, 8)
    return Mp, Mp


def _pad_tile_n(co):
    Np = _round_up(co, LANE)
    tn = TN_MAX if Np % TN_MAX == 0 else LANE
    return Np, tn


def _pad_tile_k(K, tm):
    Kp = _round_up(K, LANE)
    for c in TK_CANDIDATES:
        if Kp % c == 0 and tm * c * 2 <= A_TILE_BYTES_BUDGET:
            return Kp, c
    return Kp, LANE


# ------------------------------ Pallas kernels ------------------------------

def _instance_norm_lrelu(y, m_real):
    """InstanceNorm over the first m_real rows of y (one image's H*W) + LeakyReLU.

    y is the f32 (tm, tn) conv+bias tile covering one whole image; statistics are
    per channel (lane), masked so zero-padded rows do not pollute them.
    """
    tm = y.shape[0]
    inv_m = 1.0 / float(m_real)
    if m_real < tm:
        rows = jax.lax.broadcasted_iota(jnp.int32, y.shape, 0)
        valid = rows < m_real
        yv = jnp.where(valid, y, 0.0)
        mean = jnp.sum(yv, axis=0, keepdims=True) * inv_m
        cen = jnp.where(valid, y - mean, 0.0)
    else:
        mean = jnp.sum(y, axis=0, keepdims=True) * inv_m
        cen = y - mean
    var = jnp.sum(cen * cen, axis=0, keepdims=True) * inv_m   # biased (PyTorch IN)
    y = (y - mean) * jax.lax.rsqrt(var + IN_EPS)
    return jnp.where(y > 0, y, LEAKY_SLOPE * y)


def _conv_mm_kernel(a_ref, b_ref, bias_ref, o_ref, acc_ref, *, leaky, inorm, m_real):
    """bf16 A(tm,tk) @ bf16 B(tk,tn), f32 acc; bias [+ IN] [+ LeakyReLU] epilogue."""
    k = pl.program_id(2)

    @pl.when(k == 0)
    def _():
        acc_ref[...] = jnp.zeros_like(acc_ref)

    acc_ref[...] += jnp.dot(a_ref[...], b_ref[...],
                            preferred_element_type=jnp.float32)

    @pl.when(k == pl.num_programs(2) - 1)
    def _():
        y = acc_ref[...] + bias_ref[...]
        if inorm:
            y = _instance_norm_lrelu(y, m_real)
        elif leaky:
            y = jnp.where(y > 0, y, LEAKY_SLOPE * y)
        o_ref[...] = y.astype(o_ref.dtype)


def _conv_mm_in_fold_kernel(a_ref, b_ref, bias_ref, wf_ref, bf_ref, o_ref, acc_ref,
                            *, m_real):
    """contract3 + InstanceNorm + LeakyReLU + folded final Conv2d(8h, 1, k=1)."""
    k = pl.program_id(2)

    @pl.when(k == 0)
    def _():
        acc_ref[...] = jnp.zeros_like(acc_ref)

    acc_ref[...] += jnp.dot(a_ref[...], b_ref[...],
                            preferred_element_type=jnp.float32)

    @pl.when(k == pl.num_programs(2) - 1)
    def _():
        y = _instance_norm_lrelu(acc_ref[...] + bias_ref[...], m_real)
        # Final 1x1 conv as a lane reduction against the zero-padded weight row,
        # so the contract3 activation never has to be written to HBM.
        o_ref[...] = (jnp.sum(y * wf_ref[...], axis=1, keepdims=True)
                      + bf_ref[...]).astype(o_ref.dtype)


# ------------------------------ pallas wrappers ------------------------------

def _matmul_flat(a, b, bias_row, *, tm, tn, tk, leaky):
    """a:(Mp,Kp) bf16 @ b:(Kp,Np) bf16 + bias:(1,Np) f32 -> (Mp,Np) bf16."""
    Mp, Kp = a.shape
    _, Np = b.shape
    grid = (Mp // tm, Np // tn, Kp // tk)
    kernel = functools.partial(_conv_mm_kernel, leaky=leaky, inorm=False, m_real=0)
    return pl.pallas_call(
        kernel,
        out_shape=jax.ShapeDtypeStruct((Mp, Np), jnp.bfloat16),
        grid=grid,
        in_specs=[
            pl.BlockSpec((tm, tk), lambda i, j, k: (i, k)),
            pl.BlockSpec((tk, tn), lambda i, j, k: (k, j)),
            pl.BlockSpec((1, tn), lambda i, j, k: (0, j)),
        ],
        out_specs=pl.BlockSpec((tm, tn), lambda i, j, k: (i, j)),
        scratch_shapes=[pltpu.VMEM((tm, tn), jnp.float32)],
        compiler_params=pltpu.CompilerParams(
            dimension_semantics=("parallel", "parallel", "arbitrary"),
            vmem_limit_bytes=_vmem_limit()),
    )(a, b, bias_row)


def _matmul_img_inorm(a, b, bias_row, *, tm, tn, tk, m_real):
    """Per-image matmul (M tile = whole image) with fused InstanceNorm+LeakyReLU."""
    Nimg, Mp, Kp = a.shape
    _, Np = b.shape
    grid = (Nimg, Np // tn, Kp // tk)
    kernel = functools.partial(_conv_mm_kernel, leaky=True, inorm=True, m_real=m_real)
    return pl.pallas_call(
        kernel,
        out_shape=jax.ShapeDtypeStruct((Nimg, Mp, Np), jnp.bfloat16),
        grid=grid,
        in_specs=[
            pl.BlockSpec((None, tm, tk), lambda n, j, k: (n, 0, k)),
            pl.BlockSpec((tk, tn), lambda n, j, k: (k, j)),
            pl.BlockSpec((1, tn), lambda n, j, k: (0, j)),
        ],
        out_specs=pl.BlockSpec((None, tm, tn), lambda n, j, k: (n, 0, j)),
        scratch_shapes=[pltpu.VMEM((tm, tn), jnp.float32)],
        compiler_params=pltpu.CompilerParams(
            dimension_semantics=("parallel", "parallel", "arbitrary"),
            vmem_limit_bytes=_vmem_limit()),
    )(a, b, bias_row)


def _matmul_img_inorm_fold(a, b, bias_row, wf_row, bf11, *, tm, tn, tk, m_real):
    """contract3: per-image matmul, fused IN+LeakyReLU and folded final 1x1 conv."""
    Nimg, Mp, Kp = a.shape
    grid = (Nimg, 1, Kp // tk)     # single N tile (tn == Np), required for the fold
    kernel = functools.partial(_conv_mm_in_fold_kernel, m_real=m_real)
    return pl.pallas_call(
        kernel,
        out_shape=jax.ShapeDtypeStruct((Nimg, Mp, 1), jnp.float32),
        grid=grid,
        in_specs=[
            pl.BlockSpec((None, tm, tk), lambda n, j, k: (n, 0, k)),
            pl.BlockSpec((tk, tn), lambda n, j, k: (k, j)),
            pl.BlockSpec((1, tn), lambda n, j, k: (0, j)),
            pl.BlockSpec((1, tn), lambda n, j, k: (0, j)),
            pl.BlockSpec((1, 1), lambda n, j, k: (0, 0)),
        ],
        out_specs=pl.BlockSpec((None, tm, 1), lambda n, j, k: (n, 0, 0)),
        scratch_shapes=[pltpu.VMEM((tm, tn), jnp.float32)],
        compiler_params=pltpu.CompilerParams(
            dimension_semantics=("parallel", "parallel", "arbitrary"),
            vmem_limit_bytes=_vmem_limit()),
    )(a, b, bias_row, wf_row, bf11)


# ------------------------------- conv layers ---------------------------------

def _reflect_pad(x, pad):
    if pad > 0:
        x = jnp.pad(x, ((0, 0), (pad, pad), (pad, pad), (0, 0)), mode="reflect")
    return x


def _im2col(x, kh, kw, stride):
    """NHWC -> (N, Ho, Wo, kh*kw*C) patches, tap order (dy, dx, c) to match weights.

    TODO(synk): fuse this into the matmul kernel (padded image resident in VMEM,
    tap windows sliced in-kernel) so the inflated patch matrix never hits HBM.
    """
    N, Hp, Wp, C = x.shape
    Ho = (Hp - kh) // stride + 1
    Wo = (Wp - kw) // stride + 1
    cols = []
    for dy in range(kh):
        for dx in range(kw):
            cols.append(x[:, dy:dy + stride * (Ho - 1) + 1:stride,
                             dx:dx + stride * (Wo - 1) + 1:stride, :])
    return jnp.concatenate(cols, axis=-1), Ho, Wo


def conv_flat(x, wmat, bias_row, cfg):
    """Reflect-padded conv as a flat (M, K) x (K, N) matmul; optional LeakyReLU."""
    x = _reflect_pad(x.astype(jnp.bfloat16), cfg["pad"])
    patches, Ho, Wo = _im2col(x, cfg["kh"], cfg["kw"], cfg["stride"])
    N = x.shape[0]
    K = patches.shape[-1]                      # kh*kw*C_real (no per-tap padding)
    M = N * Ho * Wo
    Mp, tm = _pad_tile_m(M)
    Kp, tk = _pad_tile_k(K, tm)
    Np, tn = _pad_tile_n(cfg["co"])
    assert wmat.shape == (Kp, Np), (wmat.shape, Kp, Np)
    a = patches.reshape(M, K)
    if (Mp, Kp) != (M, K):
        a = jnp.pad(a, ((0, Mp - M), (0, Kp - K)))
    out = _matmul_flat(a, wmat, bias_row, tm=tm, tn=tn, tk=tk, leaky=cfg["leaky"])
    return out[:M, :cfg["co"]].reshape(N, Ho, Wo, cfg["co"])


def conv_img_inorm(x, wmat, bias_row, cfg):
    """Conv + fused InstanceNorm + LeakyReLU (M tiled by whole images)."""
    x = _reflect_pad(x.astype(jnp.bfloat16), cfg["pad"])
    patches, Ho, Wo = _im2col(x, cfg["kh"], cfg["kw"], cfg["stride"])
    N = x.shape[0]
    K = patches.shape[-1]
    m_real = Ho * Wo
    tm = _round_up(m_real, 8)                 # whole image per M tile (fits VMEM)
    Kp, tk = _pad_tile_k(K, tm)
    Np, tn = _pad_tile_n(cfg["co"])
    assert wmat.shape == (Kp, Np), (wmat.shape, Kp, Np)
    a = patches.reshape(N, m_real, K)
    if (tm, Kp) != (m_real, K):
        a = jnp.pad(a, ((0, 0), (0, tm - m_real), (0, Kp - K)))
    out = _matmul_img_inorm(a, wmat, bias_row, tm=tm, tn=tn, tk=tk, m_real=m_real)
    return out[:, :m_real, :cfg["co"]].reshape(N, Ho, Wo, cfg["co"])


def conv_img_inorm_fold_final(x, wmat, bias_row, wf_row, bf11, cfg):
    """contract3 + IN + LeakyReLU + folded final 1x1 conv -> (N, Ho, Wo, 1) f32."""
    x = _reflect_pad(x.astype(jnp.bfloat16), cfg["pad"])
    patches, Ho, Wo = _im2col(x, cfg["kh"], cfg["kw"], cfg["stride"])
    N = x.shape[0]
    K = patches.shape[-1]
    m_real = Ho * Wo
    tm = _round_up(m_real, 8)
    Kp, tk = _pad_tile_k(K, tm)
    Np, _ = _pad_tile_n(cfg["co"])
    tn = Np                                   # single N tile so all channels are
    assert wmat.shape == (Kp, Np)             # present in the epilogue for the fold
    a = patches.reshape(N, m_real, K)
    if (tm, Kp) != (m_real, K):
        a = jnp.pad(a, ((0, 0), (0, tm - m_real), (0, Kp - K)))
    out = _matmul_img_inorm_fold(a, wmat, bias_row, wf_row, bf11,
                                 tm=tm, tn=tn, tk=tk, m_real=m_real)
    return out[:, :m_real, :].reshape(N, Ho, Wo, 1)


# ----------------------------- model definition ------------------------------

def discriminator_config(in_ch, hidden):
    return [
        dict(name="upfeature", kh=7, kw=7, stride=1, pad=3,
             ci=in_ch, co=hidden, leaky=False, inorm=False),
        dict(name="contract1", kh=4, kw=4, stride=2, pad=1,
             ci=hidden, co=hidden * 2, leaky=True, inorm=False),
        dict(name="contract2", kh=4, kw=4, stride=2, pad=1,
             ci=hidden * 2, co=hidden * 4, leaky=True, inorm=True),
        dict(name="contract3", kh=4, kw=4, stride=2, pad=1,
             ci=hidden * 4, co=hidden * 8, leaky=True, inorm=True),
    ]


def init_params(key, in_ch, hidden):
    keys = jax.random.split(key, 5)

    def conv_p(k, ci, co, ksz):
        wk, bk = jax.random.split(k)
        w = jax.random.normal(wk, (co, ci, ksz, ksz), jnp.float32)
        w = w / jnp.sqrt(float(ci * ksz * ksz))
        b = 0.1 * jax.random.normal(bk, (co,), jnp.float32)
        return w, b

    return {
        "upfeature": conv_p(keys[0], in_ch, hidden, 7),
        "contract1": conv_p(keys[1], hidden, hidden * 2, 4),
        "contract2": conv_p(keys[2], hidden * 2, hidden * 4, 4),
        "contract3": conv_p(keys[3], hidden * 4, hidden * 8, 4),
        "final":     conv_p(keys[4], hidden * 8, 1, 1),
    }


def prepare_params(params, cfgs):
    """One-time weight/bias padding + reshape into matmul-ready matrices."""
    prep = {}
    for cfg in cfgs:
        w, b = params[cfg["name"]]
        co, ci, kh, kw = w.shape
        K = kh * kw * ci                                   # real K (no per-tap pad)
        Kp = _round_up(K, LANE)
        Np = _round_up(co, LANE)
        wt = jnp.transpose(w, (2, 3, 1, 0)).reshape(K, co)  # (dy, dx, ci) x co
        wmat = jnp.pad(wt, ((0, Kp - K), (0, Np - co))).astype(jnp.bfloat16)
        bias_row = jnp.pad(b, (0, Np - co)).reshape(1, Np).astype(jnp.float32)
        prep[cfg["name"]] = (wmat, bias_row)

    wf, bf = params["final"]                               # (1, 8h, 1, 1), (1,)
    ci = wf.shape[1]
    Npf = _round_up(cfgs[-1]["co"], LANE)
    w_row = jnp.pad(wf.reshape(1, ci), ((0, 0), (0, Npf - ci))).astype(jnp.float32)
    prep["final"] = (w_row, bf.reshape(1, 1).astype(jnp.float32))
    return prep


def discriminator_forward(prep, x_nchw, cfgs):
    x = jnp.transpose(x_nchw, (0, 2, 3, 1)).astype(jnp.bfloat16)   # NCHW -> NHWC
    up, c1, c2, c3 = cfgs
    x = conv_flat(x, *prep["upfeature"], up)              # conv only
    x = conv_flat(x, *prep["contract1"], c1)              # conv + LeakyReLU
    x = conv_img_inorm(x, *prep["contract2"], c2)         # conv + IN + LeakyReLU
    wf_row, bf11 = prep["final"]
    y = conv_img_inorm_fold_final(x, *prep["contract3"], wf_row, bf11, c3)
    return jnp.transpose(y, (0, 3, 1, 2))                 # (N, 1, H/8, W/8) f32


# ------------------------- pure-JAX reference (check) ------------------------

def _reference_forward(params, x):
    def conv(x, w, b, stride, pad):
        if pad > 0:
            x = jnp.pad(x, ((0, 0), (0, 0), (pad, pad), (pad, pad)),
                        mode="reflect")
        y = jax.lax.conv_general_dilated(
            x, w, window_strides=(stride, stride), padding="VALID",
            dimension_numbers=("NCHW", "OIHW", "NCHW"),
            precision=jax.lax.Precision.HIGHEST)
        return y + b.reshape(1, -1, 1, 1)

    def lrelu(x):
        return jnp.where(x > 0, x, LEAKY_SLOPE * x)

    def inorm(x):
        m = x.mean(axis=(2, 3), keepdims=True)
        v = ((x - m) ** 2).mean(axis=(2, 3), keepdims=True)
        return (x - m) * jax.lax.rsqrt(v + IN_EPS)

    w, b = params["upfeature"]; x0 = conv(x, w, b, 1, 3)
    w, b = params["contract1"]; x1 = lrelu(conv(x0, w, b, 2, 1))
    w, b = params["contract2"]; x2 = lrelu(inorm(conv(x1, w, b, 2, 1)))
    w, b = params["contract3"]; x3 = lrelu(inorm(conv(x2, w, b, 2, 1)))
    w, b = params["final"]
    return conv(x3, w, b, 1, 0)


# ----------------------------------- main ------------------------------------

if __name__ == "__main__":
    IN_CH, HIDDEN = 3, 8
    B, H, W = 2, 32, 32

    key = jax.random.PRNGKey(0)
    pkey, xkey = jax.random.split(key)
    cfgs = discriminator_config(IN_CH, HIDDEN)
    params = init_params(pkey, IN_CH, HIDDEN)
    prep = prepare_params(params, cfgs)                    # one-time weight prep
    x = jax.random.normal(xkey, (B, IN_CH, H, W), jnp.float32)

    fwd = jax.jit(functools.partial(discriminator_forward, cfgs=cfgs))
    out = jax.block_until_ready(fwd(prep, x))

    assert out.shape == (B, 1, H // 8, W // 8), out.shape
    assert bool(jnp.all(jnp.isfinite(out)))

    ref = _reference_forward(params, x)
    tol = 0.08 * (1.0 + float(jnp.max(jnp.abs(ref))))      # bf16 MXU + 2x InstanceNorm
    max_err = float(jnp.max(jnp.abs(out - ref)))
    assert max_err < tol, (max_err, tol)

    print("KERNEL_OK")
</pallas_src>

<mosaic_0001>
module attributes {stable_mosaic.version = 11 : i64} {
  func.func @_conv_mm_kernel(%arg0: i32, %arg1: i32, %arg2: i32, %arg3: memref<512x256xbf16, #tpu.memory_space<vmem>>, %arg4: memref<256x128xbf16, #tpu.memory_space<vmem>>, %arg5: memref<1x128xf32, #tpu.memory_space<vmem>>, %arg6: memref<512x128xbf16, #tpu.memory_space<vmem>>, %arg7: memref<512x128xf32, #tpu.memory_space<vmem>>) attributes {dimension_semantics = [#tpu.dimension_semantics<parallel>, #tpu.dimension_semantics<parallel>, #tpu.dimension_semantics<arbitrary>], iteration_bounds = array<i64: 4, 1, 1>, scalar_prefetch = 0 : i64, scratch_operands = 1 : i64, tpu.core_type = #tpu.core_type<tc>, window_params = [{transform_indices = @transform_0, window_bounds = array<i64: 512, 256>}, {transform_indices = @transform_1, window_bounds = array<i64: 256, 128>}, {transform_indices = @transform_2, window_bounds = array<i64: 1, 128>}, {transform_indices = @transform_3, window_bounds = array<i64: 512, 128>}]} {
    %c0_i32 = arith.constant 0 : i32
    %0 = arith.cmpi eq, %arg2, %c0_i32 : i32
    %1 = arith.extui %0 : i1 to i32
    %c0_i32_0 = arith.constant 0 : i32
    %2 = arith.cmpi ne, %1, %c0_i32_0 : i32
    scf.if %2 {
      %cst_10 = arith.constant 0.000000e+00 : f32
      %12 = vector.broadcast %cst_10 : f32 to vector<512x128xf32>
      %c0_11 = arith.constant 0 : index
      %c0_12 = arith.constant 0 : index
      %13 = vector.load %arg7[%c0_11, %c0_12] : memref<512x128xf32, #tpu.memory_space<vmem>>, vector<512x128xf32>
      tpu.vector_store %arg7[%c0_11, %c0_12], %12 {strides = array<i32>} : memref<512x128xf32, #tpu.memory_space<vmem>>, vector<512x128xf32>,
    } else {
    }
    %c0 = arith.constant 0 : index
    %c0_1 = arith.constant 0 : index
    %3 = vector.load %arg7[%c0, %c0_1] : memref<512x128xf32, #tpu.memory_space<vmem>>, vector<512x128xf32>
    %c0_2 = arith.constant 0 : index
    %c0_3 = arith.constant 0 : index
    %4 = vector.load %arg3[%c0_2, %c0_3] : memref<512x256xbf16, #tpu.memory_space<vmem>>, vector<512x256xbf16>
    %c0_4 = arith.constant 0 : index
    %c0_5 = arith.constant 0 : index
    %5 = vector.load %arg4[%c0_4, %c0_5] : memref<256x128xbf16, #tpu.memory_space<vmem>>, vector<256x128xbf16>
    %cst = arith.constant dense<0.000000e+00> : vector<512x128xf32>
    %6 = tpu.matmul %4, %5, %cst {dimension_numbers = #tpu.dot_dimension_numbers<[1], [0], [0], [1], [0, 0, 1, 1], [], []>} : vector<512x256xbf16>, vector<256x128xbf16>, vector<512x128xf32> -> vector<512x128xf32>
    %7 = arith.addf %3, %6 : vector<512x128xf32>
    %c0_6 = arith.constant 0 : index
    %c0_7 = arith.constant 0 : index
    %8 = vector.load %arg7[%c0_6, %c0_7] : memref<512x128xf32, #tpu.memory_space<vmem>>, vector<512x128xf32>
    tpu.vector_store %arg7[%c0_6, %c0_7], %7 {strides = array<i32>} : memref<512x128xf32, #tpu.memory_space<vmem>>, vector<512x128xf32>,
    %c0_i32_8 = arith.constant 0 : i32
    %9 = arith.cmpi eq, %arg2, %c0_i32_8 : i32
    %10 = arith.extui %9 : i1 to i32
    %c0_i32_9 = arith.constant 0 : i32
    %11 = arith.cmpi ne, %10, %c0_i32_9 : i32
    scf.if %11 {
      %c0_10 = arith.constant 0 : index
      %c0_11 = arith.constant 0 : index
      %12 = vector.load %arg7[%c0_10, %c0_11] : memref<512x128xf32, #tpu.memory_space<vmem>>, vector<512x128xf32>
      %c0_12 = arith.constant 0 : index
      %c0_13 = arith.constant 0 : index
      %13 = vector.load %arg5[%c0_12, %c0_13] : memref<1x128xf32, #tpu.memory_space<vmem>>, vector<1x128xf32>
      %14 = vector.broadcast %13 : vector<1x128xf32> to vector<512x128xf32>
      %15 = arith.addf %12, %14 : vector<512x128xf32>
      %16 = arith.truncf %15 : vector<512x128xf32> to vector<512x128xbf16>
      %c0_14 = arith.constant 0 : index
      %c0_15 = arith.constant 0 : index
      %17 = vector.load %arg6[%c0_14, %c0_15] : memref<512x128xbf16, #tpu.memory_space<vmem>>, vector<512x128xbf16>
      tpu.vector_store %arg6[%c0_14, %c0_15], %16 {strides = array<i32>} : memref<512x128xbf16, #tpu.memory_space<vmem>>, vector<512x128xbf16>,
    } else {
    }
    return
  }
  func.func @transform_0(%arg0: i32, %arg1: i32, %arg2: i32) -> (i32, i32) {
    %c0_i32 = arith.constant 0 : i32
    return %arg0, %arg2 : i32, i32
  }
  func.func @transform_1(%arg0: i32, %arg1: i32, %arg2: i32) -> (i32, i32) {
    %c0_i32 = arith.constant 0 : i32
    return %arg2, %arg1 : i32, i32
  }
  func.func @transform_2(%arg0: i32, %arg1: i32, %arg2: i32) -> (i32, i32) {
    %c0_i32 = arith.constant 0 : i32
    %c0_i32_0 = arith.constant 0 : i32
    return %c0_i32, %arg1 : i32, i32
  }
  func.func @transform_3(%arg0: i32, %arg1: i32, %arg2: i32) -> (i32, i32) {
    %c0_i32 = arith.constant 0 : i32
    return %arg0, %arg1 : i32, i32
  }
}

module attributes {stable_mosaic.version = 11 : i64} {
  func.func @_conv_mm_kernel(%arg0: i32, %arg1: i32, %arg2: i32, %arg3: memref<256x128xbf16, #tpu.memory_space<vmem>>, %arg4: memref<128x128xbf16, #tpu.memory_space<vmem>>, %arg5: memref<1x128xf32, #tpu.memory_space<vmem>>, %arg6: memref<256x128xbf16, #tpu.memory_space<vmem>>, %arg7: memref<256x128xf32, #tpu.memory_space<vmem>>) attributes {dimension_semantics = [#tpu.dimension_semantics<parallel>, #tpu.dimension_semantics<parallel>, #tpu.dimension_semantics<arbitrary>], iteration_bounds = array<i64: 2, 1, 1>, scalar_prefetch = 0 : i64, scratch_operands = 1 : i64, tpu.core_type = #tpu.core_type<tc>, window_params = [{transform_indices = @transform_0, window_bounds = array<i64: 256, 128>}, {transform_indices = @transform_1, window_bounds = array<i64: 128, 128>}, {transform_indices = @transform_2, window_bounds = array<i64: 1, 128>}, {transform_indices = @transform_3, window_bounds = array<i64: 256, 128>}]} {
    %c0_i32 = arith.constant 0 : i32
    %0 = arith.cmpi eq, %arg2, %c0_i32 : i32
    %1 = arith.extui %0 : i1 to i32
    %c0_i32_0 = arith.constant 0 : i32
    %2 = arith.cmpi ne, %1, %c0_i32_0 : i32
    scf.if %2 {
      %cst_10 = arith.constant 0.000000e+00 : f32
      %12 = vector.broadcast %cst_10 : f32 to vector<256x128xf32>
      %c0_11 = arith.constant 0 : index
      %c0_12 = arith.constant 0 : index
      %13 = vector.load %arg7[%c0_11, %c0_12] : memref<256x128xf32, #tpu.memory_space<vmem>>, vector<256x128xf32>
      tpu.vector_store %arg7[%c0_11, %c0_12], %12 {strides = array<i32>} : memref<256x128xf32, #tpu.memory_space<vmem>>, vector<256x128xf32>,
    } else {
    }
    %c0 = arith.constant 0 : index
    %c0_1 = arith.constant 0 : index
    %3 = vector.load %arg7[%c0, %c0_1] : memref<256x128xf32, #tpu.memory_space<vmem>>, vector<256x128xf32>
    %c0_2 = arith.constant 0 : index
    %c0_3 = arith.constant 0 : index
    %4 = vector.load %arg3[%c0_2, %c0_3] : memref<256x128xbf16, #tpu.memory_space<vmem>>, vector<256x128xbf16>
    %c0_4 = arith.constant 0 : index
    %c0_5 = arith.constant 0 : index
    %5 = vector.load %arg4[%c0_4, %c0_5] : memref<128x128xbf16, #tpu.memory_space<vmem>>, vector<128x128xbf16>
    %cst = arith.constant dense<0.000000e+00> : vector<256x128xf32>
    %6 = tpu.matmul %4, %5, %cst {dimension_numbers = #tpu.dot_dimension_numbers<[1], [0], [0], [1], [0, 0, 1, 1], [], []>} : vector<256x128xbf16>, vector<128x128xbf16>, vector<256x128xf32> -> vector<256x128xf32>
    %7 = arith.addf %3, %6 : vector<256x128xf32>
    %c0_6 = arith.constant 0 : index
    %c0_7 = arith.constant 0 : index
    %8 = vector.load %arg7[%c0_6, %c0_7] : memref<256x128xf32, #tpu.memory_space<vmem>>, vector<256x128xf32>
    tpu.vector_store %arg7[%c0_6, %c0_7], %7 {strides = array<i32>} : memref<256x128xf32, #tpu.memory_space<vmem>>, vector<256x128xf32>,
    %c0_i32_8 = arith.constant 0 : i32
    %9 = arith.cmpi eq, %arg2, %c0_i32_8 : i32
    %10 = arith.extui %9 : i1 to i32
    %c0_i32_9 = arith.constant 0 : i32
    %11 = arith.cmpi ne, %10, %c0_i32_9 : i32
    scf.if %11 {
      %c0_10 = arith.constant 0 : index
      %c0_11 = arith.constant 0 : index
      %12 = vector.load %arg7[%c0_10, %c0_11] : memref<256x128xf32, #tpu.memory_space<vmem>>, vector<256x128xf32>
      %c0_12 = arith.constant 0 : index
      %c0_13 = arith.constant 0 : index
      %13 = vector.load %arg5[%c0_12, %c0_13] : memref<1x128xf32, #tpu.memory_space<vmem>>, vector<1x128xf32>
      %14 = vector.broadcast %13 : vector<1x128xf32> to vector<256x128xf32>
      %15 = arith.addf %12, %14 : vector<256x128xf32>
      %cst_14 = arith.constant 0.000000e+00 : f32
      %16 = vector.broadcast %cst_14 : f32 to vector<256x128xf32>
      %17 = arith.cmpf ogt, %15, %16 : vector<256x128xf32>
      %cst_15 = arith.constant 2.000000e-01 : f32
      %18 = vector.broadcast %cst_15 : f32 to vector<256x128xf32>
      %19 = arith.mulf %18, %15 : vector<256x128xf32>
      %20 = arith.select %17, %15, %19 : vector<256x128xi1>, vector<256x128xf32>
      %21 = arith.truncf %20 : vector<256x128xf32> to vector<256x128xbf16>
      %c0_16 = arith.constant 0 : index
      %c0_17 = arith.constant 0 : index
      %22 = vector.load %arg6[%c0_16, %c0_17] : memref<256x128xbf16, #tpu.memory_space<vmem>>, vector<256x128xbf16>
      tpu.vector_store %arg6[%c0_16, %c0_17], %21 {strides = array<i32>} : memref<256x128xbf16, #tpu.memory_space<vmem>>, vector<256x128xbf16>,
    } else {
    }
    return
  }
  func.func @transform_0(%arg0: i32, %arg1: i32, %arg2: i32) -> (i32, i32) {
    %c0_i32 = arith.constant 0 : i32
    return %arg0, %arg2 : i32, i32
  }
  func.func @transform_1(%arg0: i32, %arg1: i32, %arg2: i32) -> (i32, i32) {
    %c0_i32 = arith.constant 0 : i32
    return %arg2, %arg1 : i32, i32
  }
  func.func @transform_2(%arg0: i32, %arg1: i32, %arg2: i32) -> (i32, i32) {
    %c0_i32 = arith.constant 0 : i32
    %c0_i32_0 = arith.constant 0 : i32
    return %c0_i32, %arg1 : i32, i32
  }
  func.func @transform_3(%arg0: i32, %arg1: i32, %arg2: i32) -> (i32, i32) {
    %c0_i32 = arith.constant 0 : i32
    return %arg0, %arg1 : i32, i32
  }
}

module attributes {stable_mosaic.version = 11 : i64} {
  func.func @_conv_mm_kernel(%arg0: i32, %arg1: i32, %arg2: i32, %arg3: memref<1x64x256xbf16, #tpu.memory_space<vmem>>, %arg4: memref<256x128xbf16, #tpu.memory_space<vmem>>, %arg5: memref<1x128xf32, #tpu.memory_space<vmem>>, %arg6: memref<1x64x128xbf16, #tpu.memory_space<vmem>>, %arg7: memref<64x128xf32, #tpu.memory_space<vmem>>) attributes {dimension_semantics = [#tpu.dimension_semantics<parallel>, #tpu.dimension_semantics<parallel>, #tpu.dimension_semantics<arbitrary>], iteration_bounds = array<i64: 2, 1, 1>, scalar_prefetch = 0 : i64, scratch_operands = 1 : i64, tpu.core_type = #tpu.core_type<tc>, window_params = [{transform_indices = @transform_0, window_bounds = array<i64: 1, 64, 256>}, {transform_indices = @transform_1, window_bounds = array<i64: 256, 128>}, {transform_indices = @transform_2, window_bounds = array<i64: 1, 128>}, {transform_indices = @transform_3, window_bounds = array<i64: 1, 64, 128>}]} {
    %c0_i32 = arith.constant 0 : i32
    %0 = arith.cmpi eq, %arg2, %c0_i32 : i32
    %1 = arith.extui %0 : i1 to i32
    %c0_i32_0 = arith.constant 0 : i32
    %2 = arith.cmpi ne, %1, %c0_i32_0 : i32
    scf.if %2 {
      %cst_11 = arith.constant 0.000000e+00 : f32
      %13 = vector.broadcast %cst_11 : f32 to vector<64x128xf32>
      %c0_12 = arith.constant 0 : index
      %c0_13 = arith.constant 0 : index
      %14 = vector.load %arg7[%c0_12, %c0_13] : memref<64x128xf32, #tpu.memory_space<vmem>>, vector<64x128xf32>
      tpu.vector_store %arg7[%c0_12, %c0_13], %13 {strides = array<i32>} : memref<64x128xf32, #tpu.memory_space<vmem>>, vector<64x128xf32>,
    } else {
    }
    %c0 = arith.constant 0 : index
    %c0_1 = arith.constant 0 : index
    %3 = vector.load %arg7[%c0, %c0_1] : memref<64x128xf32, #tpu.memory_space<vmem>>, vector<64x128xf32>
    %c0_2 = arith.constant 0 : index
    %c0_3 = arith.constant 0 : index
    %c0_4 = arith.constant 0 : index
    %4 = vector.load %arg3[%c0_2, %c0_3, %c0_4] : memref<1x64x256xbf16, #tpu.memory_space<vmem>>, vector<1x64x256xbf16>
    %5 = vector.shape_cast %4 : vector<1x64x256xbf16> to vector<64x256xbf16>
    %c0_5 = arith.constant 0 : index
    %c0_6 = arith.constant 0 : index
    %6 = vector.load %arg4[%c0_5, %c0_6] : memref<256x128xbf16, #tpu.memory_space<vmem>>, vector<256x128xbf16>
    %cst = arith.constant dense<0.000000e+00> : vector<64x128xf32>
    %7 = tpu.matmul %5, %6, %cst {dimension_numbers = #tpu.dot_dimension_numbers<[1], [0], [0], [1], [0, 0, 1, 1], [], []>} : vector<64x256xbf16>, vector<256x128xbf16>, vector<64x128xf32> -> vector<64x128xf32>
    %8 = arith.addf %3, %7 : vector<64x128xf32>
    %c0_7 = arith.constant 0 : index
    %c0_8 = arith.constant 0 : index
    %9 = vector.load %arg7[%c0_7, %c0_8] : memref<64x128xf32, #tpu.memory_space<vmem>>, vector<64x128xf32>
    tpu.vector_store %arg7[%c0_7, %c0_8], %8 {strides = array<i32>} : memref<64x128xf32, #tpu.memory_space<vmem>>, vector<64x128xf32>,
    %c0_i32_9 = arith.constant 0 : i32
    %10 = arith.cmpi eq, %arg2, %c0_i32_9 : i32
    %11 = arith.extui %10 : i1 to i32
    %c0_i32_10 = arith.constant 0 : i32
    %12 = arith.cmpi ne, %11, %c0_i32_10 : i32
    scf.if %12 {
      %c0_11 = arith.constant 0 : index
      %c0_12 = arith.constant 0 : index
      %13 = vector.load %arg7[%c0_11, %c0_12] : memref<64x128xf32, #tpu.memory_space<vmem>>, vector<64x128xf32>
      %c0_13 = arith.constant 0 : index
      %c0_14 = arith.constant 0 : index
      %14 = vector.load %arg5[%c0_13, %c0_14] : memref<1x128xf32, #tpu.memory_space<vmem>>, vector<1x128xf32>
      %15 = vector.broadcast %14 : vector<1x128xf32> to vector<64x128xf32>
      %16 = arith.addf %13, %15 : vector<64x128xf32>
      %cst_15 = arith.constant dense<0.000000e+00> : vector<128xf32>
      %17 = vector.multi_reduction <add>, %16, %cst_15 [0] : vector<64x128xf32> to vector<128xf32>
      %18 = vector.shape_cast %17 : vector<128xf32> to vector<1x128xf32>
      %cst_16 = arith.constant 1.562500e-02 : f32
      %19 = vector.broadcast %cst_16 : f32 to vector<1x128xf32>
      %20 = arith.mulf %18, %19 : vector<1x128xf32>
      %21 = vector.broadcast %20 : vector<1x128xf32> to vector<64x128xf32>
      %22 = arith.subf %16, %21 : vector<64x128xf32>
      %23 = arith.mulf %22, %22 : vector<64x128xf32>
      %cst_17 = arith.constant dense<0.000000e+00> : vector<128xf32>
      %24 = vector.multi_reduction <add>, %23, %cst_17 [0] : vector<64x128xf32> to vector<128xf32>
      %25 = vector.shape_cast %24 : vector<128xf32> to vector<1x128xf32>
      %cst_18 = arith.constant 1.562500e-02 : f32
      %26 = vector.broadcast %cst_18 : f32 to vector<1x128xf32>
      %27 = arith.mulf %25, %26 : vector<1x128xf32>
      %28 = vector.broadcast %20 : vector<1x128xf32> to vector<64x128xf32>
      %29 = arith.subf %16, %28 : vector<64x128xf32>
      %cst_19 = arith.constant 9.99999974E-6 : f32
      %30 = vector.broadcast %cst_19 : f32 to vector<1x128xf32>
      %31 = arith.addf %27, %30 : vector<1x128xf32>
      %32 = math.rsqrt %31 : vector<1x128xf32>
      %33 = vector.broadcast %32 : vector<1x128xf32> to vector<64x128xf32>
      %34 = arith.mulf %29, %33 : vector<64x128xf32>
      %cst_20 = arith.constant 0.000000e+00 : f32
      %35 = vector.broadcast %cst_20 : f32 to vector<64x128xf32>
      %36 = arith.cmpf ogt, %34, %35 : vector<64x128xf32>
      %cst_21 = arith.constant 2.000000e-01 : f32
      %37 = vector.broadcast %cst_21 : f32 to vector<64x128xf32>
      %38 = arith.mulf %37, %34 : vector<64x128xf32>
      %39 = arith.select %36, %34, %38 : vector<64x128xi1>, vector<64x128xf32>
      %40 = arith.truncf %39 : vector<64x128xf32> to vector<64x128xbf16>
      %c0_22 = arith.constant 0 : index
      %c0_23 = arith.constant 0 : index
      %c0_24 = arith.constant 0 : index
      %41 = vector.load %arg6[%c0_22, %c0_23, %c0_24] : memref<1x64x128xbf16, #tpu.memory_space<vmem>>, vector<1x64x128xbf16>
      %42 = vector.shape_cast %41 : vector<1x64x128xbf16> to vector<64x128xbf16>
      %43 = vector.shape_cast %40 : vector<64x128xbf16> to vector<1x64x128xbf16>
      tpu.vector_store %arg6[%c0_22, %c0_23, %c0_24], %43 {strides = array<i32>} : memref<1x64x128xbf16, #tpu.memory_space<vmem>>, vector<1x64x128xbf16>,
    } else {
    }
    return
  }
  func.func @transform_0(%arg0: i32, %arg1: i32, %arg2: i32) -> (i32, i32, i32) {
    %c0_i32 = arith.constant 0 : i32
    %c0_i32_0 = arith.constant 0 : i32
    return %arg0, %c0_i32, %arg2 : i32, i32, i32
  }
  func.func @transform_1(%arg0: i32, %arg1: i32, %arg2: i32) -> (i32, i32) {
    %c0_i32 = arith.constant 0 : i32
    return %arg2, %arg1 : i32, i32
  }
  func.func @transform_2(%arg0: i32, %arg1: i32, %arg2: i32) -> (i32, i32) {
    %c0_i32 = arith.constant 0 : i32
    %c0_i32_0 = arith.constant 0 : i32
    return %c0_i32, %arg1 : i32, i32
  }
  func.func @transform_3(%arg0: i32, %arg1: i32, %arg2: i32) -> (i32, i32, i32) {
    %c0_i32 = arith.constant 0 : i32
    %c0_i32_0 = arith.constant 0 : i32
    return %arg0, %c0_i32, %arg1 : i32, i32, i32
  }
}

module attributes {stable_mosaic.version = 11 : i64} {
  func.func @_conv_mm_in_fold_kernel(%arg0: i32, %arg1: i32, %arg2: i32, %arg3: memref<1x16x512xbf16, #tpu.memory_space<vmem>>, %arg4: memref<512x128xbf16, #tpu.memory_space<vmem>>, %arg5: memref<1x128xf32, #tpu.memory_space<vmem>>, %arg6: memref<1x128xf32, #tpu.memory_space<vmem>>, %arg7: memref<1x1xf32, #tpu.memory_space<vmem>>, %arg8: memref<1x16x1xf32, #tpu.memory_space<vmem>>, %arg9: memref<16x128xf32, #tpu.memory_space<vmem>>) attributes {dimension_semantics = [#tpu.dimension_semantics<parallel>, #tpu.dimension_semantics<parallel>, #tpu.dimension_semantics<arbitrary>], iteration_bounds = array<i64: 2, 1, 1>, scalar_prefetch = 0 : i64, scratch_operands = 1 : i64, tpu.core_type = #tpu.core_type<tc>, window_params = [{transform_indices = @transform_0, window_bounds = array<i64: 1, 16, 512>}, {transform_indices = @transform_1, window_bounds = array<i64: 512, 128>}, {transform_indices = @transform_2, window_bounds = array<i64: 1, 128>}, {transform_indices = @transform_3, window_bounds = array<i64: 1, 128>}, {pipeline_mode = #tpu.pipeline_mode<synchronous>, transform_indices = @transform_4, window_bounds = array<i64: 1, 1>}, {transform_indices = @transform_5, window_bounds = array<i64: 1, 16, 1>}]} {
    %c0_i32 = arith.constant 0 : i32
    %0 = arith.cmpi eq, %arg2, %c0_i32 : i32
    %1 = arith.extui %0 : i1 to i32
    %c0_i32_0 = arith.constant 0 : i32
    %2 = arith.cmpi ne, %1, %c0_i32_0 : i32
    scf.if %2 {
      %cst_11 = arith.constant 0.000000e+00 : f32
      %13 = vector.broadcast %cst_11 : f32 to vector<16x128xf32>
      %c0_12 = arith.constant 0 : index
      %c0_13 = arith.constant 0 : index
      %14 = vector.load %arg9[%c0_12, %c0_13] : memref<16x128xf32, #tpu.memory_space<vmem>>, vector<16x128xf32>
      tpu.vector_store %arg9[%c0_12, %c0_13], %13 {strides = array<i32>} : memref<16x128xf32, #tpu.memory_space<vmem>>, vector<16x128xf32>,
    } else {
    }
    %c0 = arith.constant 0 : index
    %c0_1 = arith.constant 0 : index
    %3 = vector.load %arg9[%c0, %c0_1] : memref<16x128xf32, #tpu.memory_space<vmem>>, vector<16x128xf32>
    %c0_2 = arith.constant 0 : index
    %c0_3 = arith.constant 0 : index
    %c0_4 = arith.constant 0 : index
    %4 = vector.load %arg3[%c0_2, %c0_3, %c0_4] : memref<1x16x512xbf16, #tpu.memory_space<vmem>>, vector<1x16x512xbf16>
    %5 = vector.shape_cast %4 : vector<1x16x512xbf16> to vector<16x512xbf16>
    %c0_5 = arith.constant 0 : index
    %c0_6 = arith.constant 0 : index
    %6 = vector.load %arg4[%c0_5, %c0_6] : memref<512x128xbf16, #tpu.memory_space<vmem>>, vector<512x128xbf16>
    %cst = arith.constant dense<0.000000e+00> : vector<16x128xf32>
    %7 = tpu.matmul %5, %6, %cst {dimension_numbers = #tpu.dot_dimension_numbers<[1], [0], [0], [1], [0, 0, 1, 1], [], []>} : vector<16x512xbf16>, vector<512x128xbf16>, vector<16x128xf32> -> vector<16x128xf32>
    %8 = arith.addf %3, %7 : vector<16x128xf32>
    %c0_7 = arith.constant 0 : index
    %c0_8 = arith.constant 0 : index
    %9 = vector.load %arg9[%c0_7, %c0_8] : memref<16x128xf32, #tpu.memory_space<vmem>>, vector<16x128xf32>
    tpu.vector_store %arg9[%c0_7, %c0_8], %8 {strides = array<i32>} : memref<16x128xf32, #tpu.memory_space<vmem>>, vector<16x128xf32>,
    %c0_i32_9 = arith.constant 0 : i32
    %10 = arith.cmpi eq, %arg2, %c0_i32_9 : i32
    %11 = arith.extui %10 : i1 to i32
    %c0_i32_10 = arith.constant 0 : i32
    %12 = arith.cmpi ne, %11, %c0_i32_10 : i32
    scf.if %12 {
      %c0_11 = arith.constant 0 : index
      %c0_12 = arith.constant 0 : index
      %13 = vector.load %arg9[%c0_11, %c0_12] : memref<16x128xf32, #tpu.memory_space<vmem>>, vector<16x128xf32>
      %c0_13 = arith.constant 0 : index
      %c0_14 = arith.constant 0 : index
      %14 = vector.load %arg5[%c0_13, %c0_14] : memref<1x128xf32, #tpu.memory_space<vmem>>, vector<1x128xf32>
      %15 = vector.broadcast %14 : vector<1x128xf32> to vector<16x128xf32>
      %16 = arith.addf %13, %15 : vector<16x128xf32>
      %cst_15 = arith.constant dense<0.000000e+00> : vector<128xf32>
      %17 = vector.multi_reduction <add>, %16, %cst_15 [0] : vector<16x128xf32> to vector<128xf32>
      %18 = vector.shape_cast %17 : vector<128xf32> to vector<1x128xf32>
      %cst_16 = arith.constant 6.250000e-02 : f32
      %19 = vector.broadcast %cst_16 : f32 to vector<1x128xf32>
      %20 = arith.mulf %18, %19 : vector<1x128xf32>
      %21 = vector.broadcast %20 : vector<1x128xf32> to vector<16x128xf32>
      %22 = arith.subf %16, %21 : vector<16x128xf32>
      %23 = arith.mulf %22, %22 : vector<16x128xf32>
      %cst_17 = arith.constant dense<0.000000e+00> : vector<128xf32>
      %24 = vector.multi_reduction <add>, %23, %cst_17 [0] : vector<16x128xf32> to vector<128xf32>
      %25 = vector.shape_cast %24 : vector<128xf32> to vector<1x128xf32>
      %cst_18 = arith.constant 6.250000e-02 : f32
      %26 = vector.broadcast %cst_18 : f32 to vector<1x128xf32>
      %27 = arith.mulf %25, %26 : vector<1x128xf32>
      %28 = vector.broadcast %20 : vector<1x128xf32> to vector<16x128xf32>
      %29 = arith.subf %16, %28 : vector<16x128xf32>
      %cst_19 = arith.constant 9.99999974E-6 : f32
      %30 = vector.broadcast %cst_19 : f32 to vector<1x128xf32>
      %31 = arith.addf %27, %30 : vector<1x128xf32>
      %32 = math.rsqrt %31 : vector<1x128xf32>
      %33 = vector.broadcast %32 : vector<1x128xf32> to vector<16x128xf32>
      %34 = arith.mulf %29, %33 : vector<16x128xf32>
      %cst_20 = arith.constant 0.000000e+00 : f32
      %35 = vector.broadcast %cst_20 : f32 to vector<16x128xf32>
      %36 = arith.cmpf ogt, %34, %35 : vector<16x128xf32>
      %cst_21 = arith.constant 2.000000e-01 : f32
      %37 = vector.broadcast %cst_21 : f32 to vector<16x128xf32>
      %38 = arith.mulf %37, %34 : vector<16x128xf32>
      %39 = arith.select %36, %34, %38 : vector<16x128xi1>, vector<16x128xf32>
      %c0_22 = arith.constant 0 : index
      %c0_23 = arith.constant 0 : index
      %40 = vector.load %arg6[%c0_22, %c0_23] : memref<1x128xf32, #tpu.memory_space<vmem>>, vector<1x128xf32>
      %41 = vector.broadcast %40 : vector<1x128xf32> to vector<16x128xf32>
      %42 = arith.mulf %39, %41 : vector<16x128xf32>
      %cst_24 = arith.constant dense<0.000000e+00> : vector<16xf32>
      %43 = vector.multi_reduction <add>, %42, %cst_24 [1] : vector<16x128xf32> to vector<16xf32>
      %44 = vector.shape_cast %43 : vector<16xf32> to vector<16x1xf32>
      %c0_25 = arith.constant 0 : index
      %c0_26 = arith.constant 0 : index
      %45 = vector.load %arg7[%c0_25, %c0_26] : memref<1x1xf32, #tpu.memory_space<vmem>>, vector<1x1xf32>
      %46 = vector.broadcast %45 : vector<1x1xf32> to vector<16x1xf32>
      %47 = arith.addf %44, %46 : vector<16x1xf32>
      %c0_27 = arith.constant 0 : index
      %c0_28 = arith.constant 0 : index
      %c0_29 = arith.constant 0 : index
      %48 = vector.load %arg8[%c0_27, %c0_28, %c0_29] : memref<1x16x1xf32, #tpu.memory_space<vmem>>, vector<1x16x1xf32>
      %49 = vector.shape_cast %48 : vector<1x16x1xf32> to vector<16x1xf32>
      %50 = vector.shape_cast %47 : vector<16x1xf32> to vector<1x16x1xf32>
      tpu.vector_store %arg8[%c0_27, %c0_28, %c0_29], %50 {strides = array<i32>} : memref<1x16x1xf32, #tpu.memory_space<vmem>>, vector<1x16x1xf32>,
    } else {
    }
    return
  }
  func.func @transform_0(%arg0: i32, %arg1: i32, %arg2: i32) -> (i32, i32, i32) {
    %c0_i32 = arith.constant 0 : i32
    %c0_i32_0 = arith.constant 0 : i32
    return %arg0, %c0_i32, %arg2 : i32, i32, i32
  }
  func.func @transform_1(%arg0: i32, %arg1: i32, %arg2: i32) -> (i32, i32) {
    %c0_i32 = arith.constant 0 : i32
    return %arg2, %arg1 : i32, i32
  }
  func.func @transform_2(%arg0: i32, %arg1: i32, %arg2: i32) -> (i32, i32) {
    %c0_i32 = arith.constant 0 : i32
    %c0_i32_0 = arith.constant 0 : i32
    return %c0_i32, %arg1 : i32, i32
  }
  func.func @transform_3(%arg0: i32, %arg1: i32, %arg2: i32) -> (i32, i32) {
    %c0_i32 = arith.constant 0 : i32
    %c0_i32_0 = arith.constant 0 : i32
    return %c0_i32, %arg1 : i32, i32
  }
  func.func @transform_4(%arg0: i32, %arg1: i32, %arg2: i32) -> (i32, i32) {
    %c0_i32 = arith.constant 0 : i32
    %c0_i32_0 = arith.constant 0 : i32
    %c0_i32_1 = arith.constant 0 : i32
    return %c0_i32, %c0_i32_0 : i32, i32
  }
  func.func @transform_5(%arg0: i32, %arg1: i32, %arg2: i32) -> (i32, i32, i32) {
    %c0_i32 = arith.constant 0 : i32
    %c0_i32_0 = arith.constant 0 : i32
    %c0_i32_1 = arith.constant 0 : i32
    return %arg0, %c0_i32, %c0_i32_0 : i32, i32, i32
  }
}

</mosaic_0001>

<bundles_post_ra>
// kernel: discriminator_forward.4
= control target key start
LH: loop header
LB: loop body
LE: loop exit
PB: predicated region body
PF: predicated region fallthrough
CT: control target
= control target key end

     0   :  { %s2530_s12 = smov 0   ;;  %s2532_s13 = smov 0   ;;  %s2816_s0 = inlined_call_operand.vmem [shape: bf16[2048,256], index: 0, kind: input, shape index: {}]   ;;  %s2817_s1 = inlined_call_operand.vmem [shape: bf16[256,128], index: 1, kind: input, shape index: {}]   ;;  %s2818_s2 = inlined_call_operand.vmem [shape: f32[1,128], index: 2, kind: input, shape index: {}]   ;;  %s2819_s3 = inlined_call_operand.vmem [shape: bf16[2048,128], index: 3, kind: output, shape index: {}]  }
   0x1   :  { %s2534_s14 = smov 0  }
   0x2 LB: > { %s32_s15 = sadd.s32 1, %s2503_s13  ;;  %p1907_p0 = scmp.ge.s32.totalorder %s2507_s14, 1  ;;  %s2507_s14 = sphi %s2534_s14, %s13_s14   ;;  %s2503_s13 = sphi %s2532_s13, %s2821_s13   ;;  %s2499_s12 = sphi %s2530_s12, %s2820_s12  }
   0x3   : > { %p34_p1 = scmp.ge.s32.totalorder %s32_s15, 4  ;;  %p191_p2 = scmp.lt.s32.totalorder %s2507_s14, 5 }
   0x5   : > { %s2823_s15 = smov (%p34_p1, %s32_s15), 0  ;;  %p192_p3 = pnand %p1907_p0, %p191_p2 }
   0x6   : > { %v2373_v0 = vld [vmem:[%s2817_s1] sm:$0xff] (!%p192_p3)   ;;  %v2509_v1 = vmov (!%p192_p3), 0   ;;  %s1908_s18 = sshll.u32 (!%p192_p3), %s2499_s12, 6  ;;  %v2374_v2 = vld [vmem:[%s2817_s1 + $0x8] sm:$0xff] (!%p192_p3)   ;;  %v2375_v3 = vld [vmem:[%s2817_s1 + $0x10] sm:$0xff] (!%p192_p3)  }
   0x7   : > { %195 = sbr.rel (%p192_p3) target bundleno = 410 (0x19a), region = 32  ;;  %912 = vmatprep.subr.bf16.mxu0 (!%p192_p3), %v2509_v1  ;;  %2316 = vmatprep.subr.bf16.mxu1 (!%p192_p3), %v2509_v1  ;;  %p236_p4 = scmp.lt.s32.totalorder (!%p192_p3), %s1908_s18, 255  ;;  %v2376_v4 = vld [vmem:[%s2817_s1 + $0x18] sm:$0xff] (!%p192_p3)   ;;  %v2377_v5 = vld [vmem:[%s2817_s1 + $0x20] sm:$0xff] (!%p192_p3)   ;;  %v2378_v7 = vld [vmem:[%s2817_s1 + $0x28] sm:$0xff] (!%p192_p3)  }
   0x8   : > { %913 = vmatpush1.bf16.msra.mxu0 (!%p192_p3), %v2373_v0  ;;  %2332 = vmatpush1.bf16.msra.mxu1 (!%p192_p3), %v2373_v0  ;;  %v2379_v9 = vld [vmem:[%s2817_s1 + $0x30] sm:$0xff] (!%p192_p3)   ;;  %v2380_v10 = vld [vmem:[%s2817_s1 + $0x38] sm:$0xff] (!%p192_p3)   ;;  %v2381_v11 = vld [vmem:[%s2817_s1 + $0x40] sm:$0xff] (!%p192_p3)  }
   0x9   : > { %914 = vmatprep.subr.bf16.mxu0 (!%p192_p3), %v2509_v1  ;;  %2317 = vmatprep.subr.bf16.mxu1 (!%p192_p3), %v2509_v1  ;;  %v2382_v12 = vld [vmem:[%s2817_s1 + $0x48] sm:$0xff] (!%p192_p3)   ;;  %v2383_v13 = vld [vmem:[%s2817_s1 + $0x50] sm:$0xff] (!%p192_p3)   ;;  %v2384_v14 = vld [vmem:[%s2817_s1 + $0x58] sm:$0xff] (!%p192_p3)  }
   0xa   : > { %v2385_v15 = vld [vmem:[%s2817_s1 + $0x60] sm:$0xff] (!%p192_p3)   ;;  %v2386_v16 = vld [vmem:[%s2817_s1 + $0x68] sm:$0xff] (!%p192_p3)   ;;  %v2387_v17 = vld [vmem:[%s2817_s1 + $0x70] sm:$0xff] (!%p192_p3)  }
   0xb   : > { %v2388_v18 = vld [vmem:[%s2817_s1 + $0x78] sm:$0xff] (!%p192_p3)  }
   0xc   : > { %915 = vmatpush1.bf16.msra.mxu0 (!%p192_p3), %v2374_v2  ;;  %2333 = vmatpush1.bf16.msra.mxu1 (!%p192_p3), %v2374_v2 }
   0xd   : > { %916 = vmatprep.subr.bf16.mxu0 (!%p192_p3), %v2509_v1  ;;  %2318 = vmatprep.subr.bf16.mxu1 (!%p192_p3), %v2509_v1 }
   0xe   : > { %s2825_s18 = smov (!%p236_p4, %s1908_s18), 255 }
   0xf   : > { %s2060_s25 = sshll.u32 %s2825_s18, 3  ;;  %s1912_s6 = sshll.u32 %s2825_s18, 2 }
  0x10   : > { %917 = vmatpush1.bf16.msra.mxu0 %v2375_v3  ;;  %2334 = vmatpush1.bf16.msra.mxu1 %v2375_v3  ;;  %s2577_s30 = scalar_lea.vmem %s2816_s0, %s2060_s25  ;;  %s2713_s8 = scalar_lea.vmem %s2819_s3, %s1912_s6 }
  0x11   : > { %918 = vmatprep.subr.bf16.mxu0 %v2509_v1  ;;  %2319 = vmatprep.subr.bf16.mxu1 %v2509_v1  ;;  %v2391_v6 = vld [vmem:[%s2577_s30 + $0x4] ss:$8 sps:$4 sm:$0xff]   ;;  %v2389_v19 = vld [vmem:[%s2577_s30] ss:$8 sps:$4 sm:$0xff]   ;;  %v2395_v21 = vld [vmem:[%s2577_s30 + $0x14] ss:$8 sps:$4 sm:$0xff]  }
  0x12   : > { %v2394_v8 = vld [vmem:[%s2577_s30 + $0x104] ss:$8 sps:$4 sm:$0xff]   ;;  %944 = vmatprep.mubr.bf16.mxu0 %v2391_v6  ;;  %v2392_v20 = vld [vmem:[%s2577_s30 + $0x100] ss:$8 sps:$4 sm:$0xff]   ;;  %v2397_v22 = vld [vmem:[%s2577_s30 + $0x114] ss:$8 sps:$4 sm:$0xff]  }
  0x13   : > { %1072 = vmatprep.mubr.bf16.mxu1 %v2394_v8  ;;  %v2399_v23 = vld [vmem:[%s2577_s30 + $0x10] ss:$8 sps:$4 sm:$0xff]   ;;  %v2401_v25 = vld [vmem:[%s2577_s30 + $0x24] ss:$8 sps:$4 sm:$0xff]   ;;  %v2405_v27 = vld [vmem:[%s2577_s30 + $0x20] ss:$8 sps:$4 sm:$0xff]  }
  0x14   : > { %919 = vmatpush1.bf16.msra.mxu0 %v2376_v4  ;;  %2335 = vmatpush1.bf16.msra.mxu1 %v2376_v4  ;;  %v2400_v24 = vld [vmem:[%s2577_s30 + $0x110] ss:$8 sps:$4 sm:$0xff]   ;;  %v2403_v26 = vld [vmem:[%s2577_s30 + $0x124] ss:$8 sps:$4 sm:$0xff]   ;;  %v2406_v28 = vld [vmem:[%s2577_s30 + $0x120] ss:$8 sps:$4 sm:$0xff]  }
  0x15   : > { %920 = vmatprep.subr.bf16.mxu0 %v2509_v1  ;;  %2320 = vmatprep.subr.bf16.mxu1 %v2509_v1  ;;  %v2407_v29 = vld [vmem:[%s2577_s30 + $0x34] ss:$8 sps:$4 sm:$0xff]   ;;  %v2411_v31 = vld [vmem:[%s2577_s30 + $0x30] ss:$8 sps:$4 sm:$0xff]   ;;  %v2413_v33 = vld [vmem:[%s2577_s30 + $0x44] ss:$8 sps:$4 sm:$0xff]  }
  0x16   : > { %v2409_v30 = vld [vmem:[%s2577_s30 + $0x134] ss:$8 sps:$4 sm:$0xff]   ;;  %v2412_v32 = vld [vmem:[%s2577_s30 + $0x130] ss:$8 sps:$4 sm:$0xff]   ;;  %v2415_v34 = vld [vmem:[%s2577_s30 + $0x144] ss:$8 sps:$4 sm:$0xff]  }
  0x17   : > { %v2417_v35 = vld [vmem:[%s2577_s30 + $0x40] ss:$8 sps:$4 sm:$0xff]   ;;  %v2419_v37 = vld [vmem:[%s2577_s30 + $0x54] ss:$8 sps:$4 sm:$0xff]   ;;  %v2423_v39 = vld [vmem:[%s2577_s30 + $0x50] ss:$8 sps:$4 sm:$0xff]  }
  0x18   : > { %921 = vmatpush1.bf16.msra.mxu0 %v2377_v5  ;;  %2336 = vmatpush1.bf16.msra.mxu1 %v2377_v5  ;;  %v2418_v36 = vld [vmem:[%s2577_s30 + $0x140] ss:$8 sps:$4 sm:$0xff]   ;;  %v2421_v38 = vld [vmem:[%s2577_s30 + $0x154] ss:$8 sps:$4 sm:$0xff]   ;;  %v2424_v40 = vld [vmem:[%s2577_s30 + $0x150] ss:$8 sps:$4 sm:$0xff]  }
  0x19   : > { %922 = vmatprep.subr.bf16.mxu0 %v2509_v1  ;;  %2321 = vmatprep.subr.bf16.mxu1 %v2509_v1  ;;  %v2425_v41 = vld [vmem:[%s2577_s30 + $0x64] ss:$8 sps:$4 sm:$0xff]   ;;  %v2429_v43 = vld [vmem:[%s2577_s30 + $0x60] ss:$8 sps:$4 sm:$0xff]   ;;  %v2431_v45 = vld [vmem:[%s2577_s30 + $0x74] ss:$8 sps:$4 sm:$0xff]  }
  0x1a   : > { %v2427_v42 = vld [vmem:[%s2577_s30 + $0x164] ss:$8 sps:$4 sm:$0xff]   ;;  %v2430_v44 = vld [vmem:[%s2577_s30 + $0x160] ss:$8 sps:$4 sm:$0xff]   ;;  %v2433_v46 = vld [vmem:[%s2577_s30 + $0x174] ss:$8 sps:$4 sm:$0xff]  }
  0x1b   : > { %v2435_v47 = vld [vmem:[%s2577_s30 + $0x70] ss:$8 sps:$4 sm:$0xff]   ;;  %v2437_v49 = vld [vmem:[%s2577_s30 + $0x84] ss:$8 sps:$4 sm:$0xff]   ;;  %v2441_v51 = vld [vmem:[%s2577_s30 + $0x80] ss:$8 sps:$4 sm:$0xff]  }
  0x1c   : > { %923 = vmatpush1.bf16.msra.mxu0 %v2378_v7  ;;  %2337 = vmatpush1.bf16.msra.mxu1 %v2378_v7  ;;  %v2436_v48 = vld [vmem:[%s2577_s30 + $0x170] ss:$8 sps:$4 sm:$0xff]   ;;  %v2439_v50 = vld [vmem:[%s2577_s30 + $0x184] ss:$8 sps:$4 sm:$0xff]   ;;  %v2442_v52 = vld [vmem:[%s2577_s30 + $0x180] ss:$8 sps:$4 sm:$0xff]  }
  0x1d   : > { %924 = vmatprep.subr.bf16.mxu0 %v2509_v1  ;;  %2322 = vmatprep.subr.bf16.mxu1 %v2509_v1  ;;  %v2443_v53 = vld [vmem:[%s2577_s30 + $0x94] ss:$8 sps:$4 sm:$0xff]   ;;  %v2447_v55 = vld [vmem:[%s2577_s30 + $0x90] ss:$8 sps:$4 sm:$0xff]   ;;  %v2449_v57 = vld [vmem:[%s2577_s30 + $0xa4] ss:$8 sps:$4 sm:$0xff]  }
  0x1e   : > { %v2445_v54 = vld [vmem:[%s2577_s30 + $0x194] ss:$8 sps:$4 sm:$0xff]   ;;  %v2448_v56 = vld [vmem:[%s2577_s30 + $0x190] ss:$8 sps:$4 sm:$0xff]   ;;  %v2451_v58 = vld [vmem:[%s2577_s30 + $0x1a4] ss:$8 sps:$4 sm:$0xff]  }
  0x1f   : > { %v2453_v59 = vld [vmem:[%s2577_s30 + $0xa0] ss:$8 sps:$4 sm:$0xff]   ;;  %v2455_v61 = vld [vmem:[%s2577_s30 + $0xb4] ss:$8 sps:$4 sm:$0xff]   ;;  %v2459_v63 = vld [vmem:[%s2577_s30 + $0xb0] ss:$8 sps:$4 sm:$0xff]  }
  0x20   : > { %925 = vmatpush1.bf16.msra.mxu0 %v2379_v9  ;;  %2338 = vmatpush1.bf16.msra.mxu1 %v2379_v9  ;;  %v2454_v60 = vld [vmem:[%s2577_s30 + $0x1a0] ss:$8 sps:$4 sm:$0xff]   ;;  %v2457_v62 = vld [vmem:[%s2577_s30 + $0x1b4] ss:$8 sps:$4 sm:$0xff]   ;;  %v2460_v0 = vld [vmem:[%s2577_s30 + $0x1b0] ss:$8 sps:$4 sm:$0xff]  }
  0x21   : > { %926 = vmatprep.subr.bf16.mxu0 %v2509_v1  ;;  %2323 = vmatprep.subr.bf16.mxu1 %v2509_v1  ;;  %v2463_v2 = vld [vmem:[%s2577_s30 + $0x1c4] ss:$8 sps:$4 sm:$0xff]   ;;  %v2465_v3 = vld [vmem:[%s2577_s30 + $0xc0] ss:$8 sps:$4 sm:$0xff]   ;;  %v2467_v5 = vld [vmem:[%s2577_s30 + $0xd4] ss:$8 sps:$4 sm:$0xff]  }
  0x22   : > { %v2466_v4 = vld [vmem:[%s2577_s30 + $0x1c0] ss:$8 sps:$4 sm:$0xff]   ;;  %v2469_v6 = vld [vmem:[%s2577_s30 + $0x1d4] ss:$8 sps:$4 sm:$0xff]   ;;  %v2471_v7 = vld [vmem:[%s2577_s30 + $0xd0] ss:$8 sps:$4 sm:$0xff]  }
  0x23   : > { %v2472_v8 = vld [vmem:[%s2577_s30 + $0x1d0] ss:$8 sps:$4 sm:$0xff]   ;;  %v2473_v9 = vld [vmem:[%s2577_s30 + $0xe4] ss:$8 sps:$4 sm:$0xff]  }
  0x24   : > { %927 = vmatpush1.bf16.msra.mxu0 %v2380_v10  ;;  %2339 = vmatpush1.bf16.msra.mxu1 %v2380_v10  ;;  %v2475_v10 = vld [vmem:[%s2577_s30 + $0x1e4] ss:$8 sps:$4 sm:$0xff]  }
  0x25   : > { %928 = vmatprep.subr.bf16.mxu0 %v2509_v1  ;;  %2324 = vmatprep.subr.bf16.mxu1 %v2509_v1 }
  0x28   : > { %929 = vmatpush1.bf16.msra.mxu0 %v2381_v11  ;;  %2340 = vmatpush1.bf16.msra.mxu1 %v2381_v11  ;;  %v2477_v11 = vld [vmem:[%s2577_s30 + $0xe0] ss:$8 sps:$4 sm:$0xff]  }
  0x29   : > { %930 = vmatprep.subr.bf16.mxu0 %v2509_v1  ;;  %2325 = vmatprep.subr.bf16.mxu1 %v2509_v1 }
  0x2c   : > { %931 = vmatpush1.bf16.msra.mxu0 %v2382_v12  ;;  %2341 = vmatpush1.bf16.msra.mxu1 %v2382_v12  ;;  %v2478_v12 = vld [vmem:[%s2577_s30 + $0x1e0] ss:$8 sps:$4 sm:$0xff]  }
  0x2d   : > { %932 = vmatprep.subr.bf16.mxu0 %v2509_v1  ;;  %2326 = vmatprep.subr.bf16.mxu1 %v2509_v1 }
  0x30   : > { %933 = vmatpush1.bf16.msra.mxu0 %v2383_v13  ;;  %2342 = vmatpush1.bf16.msra.mxu1 %v2383_v13  ;;  %v2479_v13 = vld [vmem:[%s2577_s30 + $0xf4] ss:$8 sps:$4 sm:$0xff]  }
  0x31   : > { %934 = vmatprep.subr.bf16.mxu0 %v2509_v1  ;;  %2327 = vmatprep.subr.bf16.mxu1 %v2509_v1 }
  0x34   : > { %935 = vmatpush1.bf16.msra.mxu0 %v2384_v14  ;;  %2343 = vmatpush1.bf16.msra.mxu1 %v2384_v14  ;;  %v2481_v14 = vld [vmem:[%s2577_s30 + $0x1f4] ss:$8 sps:$4 sm:$0xff]  }
  0x35   : > { %936 = vmatprep.subr.bf16.mxu0 %v2509_v1  ;;  %2328 = vmatprep.subr.bf16.mxu1 %v2509_v1 }
  0x38   : > { %937 = vmatpush1.bf16.msra.mxu0 %v2385_v15  ;;  %2344 = vmatpush1.bf16.msra.mxu1 %v2385_v15  ;;  %v2483_v15 = vld [vmem:[%s2577_s30 + $0xf0] ss:$8 sps:$4 sm:$0xff]  }
  0x39   : > { %938 = vmatprep.subr.bf16.mxu0 %v2509_v1  ;;  %2329 = vmatprep.subr.bf16.mxu1 %v2509_v1 }
  0x3c   : > { %939 = vmatpush1.bf16.msra.mxu0 %v2386_v16  ;;  %2345 = vmatpush1.bf16.msra.mxu1 %v2386_v16  ;;  %v2484_v16 = vld [vmem:[%s2577_s30 + $0x1f0] ss:$8 sps:$4 sm:$0xff]  }
  0x3d   : > { %940 = vmatprep.subr.bf16.mxu0 %v2509_v1  ;;  %2330 = vmatprep.subr.bf16.mxu1 %v2509_v1 }
  0x40   : > { %941 = vmatpush1.bf16.msra.mxu0 %v2387_v17  ;;  %2346 = vmatpush1.bf16.msra.mxu1 %v2387_v17 }
  0x41   : > { %942 = vmatprep.subr.bf16.mxu0 %v2509_v1  ;;  %2331 = vmatprep.subr.bf16.mxu1 %v2509_v1  ;;  %v2461_v1 = vld [vmem:[%s2577_s30 + $0xc4] ss:$8 sps:$4 sm:$0xff]  }
  0x44   : > { %943 = vmatpush1.bf16.msra.mxu0 %v2388_v18  ;;  %2347 = vmatpush1.bf16.msra.mxu1 %v2388_v18  ;;  %v2703_v18 = vld [vmem:[%s2818_s2] ss:$0 sm:$0xff] }
  0x47   : > { %945 = vmatmul.mubr.bf16.vlgmr.msra.gmra.mrb[0].mxu0 %v2389_v19  ;;  %1073 = vmatmul.mubr.bf16.vlgmr.msra.gmra.mrb[0].mxu1 %v2392_v20 }
  0x48   : > { %952 = vmatprep.mubr.bf16.mxu0 %v2395_v21  ;;  %1080 = vmatprep.mubr.bf16.mxu1 %v2397_v22 }
  0x4f   : > { %953 = vmatmul.mubr.bf16.gmra.mrb[4].mxu0 %v2399_v23  ;;  %1081 = vmatmul.mubr.bf16.gmra.mrb[4].mxu1 %v2400_v24 }
  0x50   : > { %960 = vmatprep.mubr.bf16.mxu0 %v2401_v25  ;;  %1088 = vmatprep.mubr.bf16.mxu1 %v2403_v26 }
  0x57   : > { %961 = vmatmul.mubr.bf16.gmra.mrb[8].mxu0 %v2405_v27  ;;  %1089 = vmatmul.mubr.bf16.gmra.mrb[8].mxu1 %v2406_v28 }
  0x58   : > { %968 = vmatprep.mubr.bf16.mxu0 %v2407_v29  ;;  %1096 = vmatprep.mubr.bf16.mxu1 %v2409_v30 }
  0x5f   : > { %969 = vmatmul.mubr.bf16.gmra.mrb[12].mxu0 %v2411_v31  ;;  %1097 = vmatmul.mubr.bf16.gmra.mrb[12].mxu1 %v2412_v32 }
  0x60   : > { %976 = vmatprep.mubr.bf16.mxu0 %v2413_v33  ;;  %1104 = vmatprep.mubr.bf16.mxu1 %v2415_v34 }
  0x67   : > { %977 = vmatmul.mubr.bf16.gmra.mrb[16].mxu0 %v2417_v35  ;;  %1105 = vmatmul.mubr.bf16.gmra.mrb[16].mxu1 %v2418_v36 }
  0x68   : > { %984 = vmatprep.mubr.bf16.mxu0 %v2419_v37  ;;  %1112 = vmatprep.mubr.bf16.mxu1 %v2421_v38 }
  0x6f   : > { %985 = vmatmul.mubr.bf16.gmra.mrb[20].mxu0 %v2423_v39  ;;  %1113 = vmatmul.mubr.bf16.gmra.mrb[20].mxu1 %v2424_v40 }
  0x70   : > { %992 = vmatprep.mubr.bf16.mxu0 %v2425_v41  ;;  %1120 = vmatprep.mubr.bf16.mxu1 %v2427_v42 }
  0x77   : > { %993 = vmatmul.mubr.bf16.gmra.mrb[24].mxu0 %v2429_v43  ;;  %1121 = vmatmul.mubr.bf16.gmra.mrb[24].mxu1 %v2430_v44 }
  0x78   : > { %1000 = vmatprep.mubr.bf16.mxu0 %v2431_v45  ;;  %1128 = vmatprep.mubr.bf16.mxu1 %v2433_v46 }
  0x7f   : > { %1001 = vmatmul.mubr.bf16.gmra.mrb[28].mxu0 %v2435_v47  ;;  %1129 = vmatmul.mubr.bf16.gmra.mrb[28].mxu1 %v2436_v48 }
  0x80   : > { %1008 = vmatprep.mubr.bf16.mxu0 %v2437_v49  ;;  %1136 = vmatprep.mubr.bf16.mxu1 %v2439_v50 }
  0x87   : > { %1009 = vmatmul.mubr.bf16.gmra.mrb[32].mxu0 %v2441_v51  ;;  %1137 = vmatmul.mubr.bf16.gmra.mrb[32].mxu1 %v2442_v52 }
  0x88   : > { %1016 = vmatprep.mubr.bf16.mxu0 %v2443_v53  ;;  %1144 = vmatprep.mubr.bf16.mxu1 %v2445_v54 }
  0x8f   : > { %1017 = vmatmul.mubr.bf16.gmra.mrb[36].mxu0 %v2447_v55  ;;  %1145 = vmatmul.mubr.bf16.gmra.mrb[36].mxu1 %v2448_v56 }
  0x90   : > { %1024 = vmatprep.mubr.bf16.mxu0 %v2449_v57  ;;  %1152 = vmatprep.mubr.bf16.mxu1 %v2451_v58 }
  0x97   : > { %1025 = vmatmul.mubr.bf16.gmra.mrb[40].mxu0 %v2453_v59  ;;  %1153 = vmatmul.mubr.bf16.gmra.mrb[40].mxu1 %v2454_v60 }
  0x98   : > { %1032 = vmatprep.mubr.bf16.mxu0 %v2455_v61  ;;  %1160 = vmatprep.mubr.bf16.mxu1 %v2457_v62 }
  0x9f   : > { %1033 = vmatmul.mubr.bf16.gmra.mrb[44].mxu0 %v2459_v63  ;;  %1161 = vmatmul.mubr.bf16.gmra.mrb[44].mxu1 %v2460_v0 }
  0xa0   : > { %1040 = vmatprep.mubr.bf16.mxu0 %v2461_v1  ;;  %1168 = vmatprep.mubr.bf16.mxu1 %v2463_v2 }
  0xa7   : > { %1041 = vmatmul.mubr.bf16.gmra.mrb[48].mxu0 %v2465_v3  ;;  %1169 = vmatmul.mubr.bf16.gmra.mrb[48].mxu1 %v2466_v4 }
  0xa8   : > { %1048 = vmatprep.mubr.bf16.mxu0 %v2467_v5  ;;  %1176 = vmatprep.mubr.bf16.mxu1 %v2469_v6 }
  0xaf   : > { %1049 = vmatmul.mubr.bf16.gmra.mrb[52].mxu0 %v2471_v7  ;;  %1177 = vmatmul.mubr.bf16.gmra.mrb[52].mxu1 %v2472_v8 }
  0xb0   : > { %1056 = vmatprep.mubr.bf16.mxu0 %v2473_v9  ;;  %1184 = vmatprep.mubr.bf16.mxu1 %v2475_v10 }
  0xb7   : > { %1057 = vmatmul.mubr.bf16.gmra.mrb[56].mxu0 %v2477_v11  ;;  %1185 = vmatmul.mubr.bf16.gmra.mrb[56].mxu1 %v2478_v12 }
  0xb8   : > { %1064 = vmatprep.mubr.bf16.mxu0 %v2479_v13  ;;  %1192 = vmatprep.mubr.bf16.mxu1 %v2481_v14 }
  0xbf   : > { %1065 = vmatmul.mubr.bf16.gmra.mrb[60].mxu0 %v2483_v15  ;;  %1193 = vmatmul.mubr.bf16.gmra.mrb[60].mxu1 %v2484_v16 }
 0x11a   : > { %v946_v17 = vpop.f32.mrb[0].mxu0  ;;  %v1074_v19 = vpop.f32.mrb[0].mxu1 }
 0x11b   : > { %v948_v20 = vpop.f32.mrb[1].mxu0  ;;  %v1076_v21 = vpop.f32.mrb[1].mxu1  ;;  %v1403_v24 = vadd.f32 %v2703_v18, %v946_v17  ;;  %v1435_v25 = vadd.f32 %v2703_v18, %v1074_v19 }
 0x11c   : > { %v949_v22 = vpop.f32.mrb[2].mxu0  ;;  %v1077_v23 = vpop.f32.mrb[2].mxu1 }
 0x11d   : > { %v1404_v26 = vadd.f32 %v2703_v18, %v949_v22  ;;  %v1436_v27 = vadd.f32 %v2703_v18, %v1077_v23  ;;  %v951_v28 = vpop.f32.mrb[3].mxu0  ;;  %v1079_v29 = vpop.f32.mrb[3].mxu1 }
 0x11f   : > { %v2128_v30 = vpack.c.bf16 %v1404_v26, %v1403_v24  ;;  %v2208_v31 = vpack.c.bf16 %v1436_v27, %v1435_v25 }
 0x121   : > { %2129 = vst [vmem:[%s2713_s8] sm:$0xff] %v2128_v30   ;;  %2300 = vst [vmem:[%s2713_s8 + $0x80] sm:$0xff] %v2208_v31  }
 0x122   : > { %v954_v32 = vpop.f32.mrb[4].mxu0  ;;  %v1082_v33 = vpop.f32.mrb[4].mxu1 }
 0x123   : > { %v956_v34 = vpop.f32.mrb[5].mxu0  ;;  %v1084_v35 = vpop.f32.mrb[5].mxu1  ;;  %v1405_v38 = vadd.f32 %v2703_v18, %v954_v32  ;;  %v1437_v39 = vadd.f32 %v2703_v18, %v1082_v33 }
 0x124   : > { %v957_v36 = vpop.f32.mrb[6].mxu0  ;;  %v1085_v37 = vpop.f32.mrb[6].mxu1 }
 0x125   : > { %v1406_v40 = vadd.f32 %v2703_v18, %v957_v36  ;;  %v1438_v41 = vadd.f32 %v2703_v18, %v1085_v37  ;;  %v959_v42 = vpop.f32.mrb[7].mxu0  ;;  %v1087_v43 = vpop.f32.mrb[7].mxu1 }
 0x127   : > { %v2133_v44 = vpack.c.bf16 %v1406_v40, %v1405_v38  ;;  %v2213_v45 = vpack.c.bf16 %v1438_v41, %v1437_v39 }
 0x129   : > { %2285 = vst [vmem:[%s2713_s8 + $0x8] sm:$0xff] %v2133_v44   ;;  %2301 = vst [vmem:[%s2713_s8 + $0x88] sm:$0xff] %v2213_v45  }
 0x12a   : > { %v962_v46 = vpop.f32.mrb[8].mxu0  ;;  %v1090_v47 = vpop.f32.mrb[8].mxu1 }
 0x12b   : > { %v964_v48 = vpop.f32.mrb[9].mxu0  ;;  %v1092_v49 = vpop.f32.mrb[9].mxu1  ;;  %v1407_v52 = vadd.f32 %v2703_v18, %v962_v46  ;;  %v1439_v53 = vadd.f32 %v2703_v18, %v1090_v47 }
 0x12c   : > { %v965_v50 = vpop.f32.mrb[10].mxu0  ;;  %v1093_v51 = vpop.f32.mrb[10].mxu1 }
 0x12d   : > { %v1408_v54 = vadd.f32 %v2703_v18, %v965_v50  ;;  %v1440_v55 = vadd.f32 %v2703_v18, %v1093_v51  ;;  %v967_v56 = vpop.f32.mrb[11].mxu0  ;;  %v1095_v57 = vpop.f32.mrb[11].mxu1 }
 0x12f   : > { %v2138_v58 = vpack.c.bf16 %v1408_v54, %v1407_v52  ;;  %v2218_v59 = vpack.c.bf16 %v1440_v55, %v1439_v53 }
 0x131   : > { %2286 = vst [vmem:[%s2713_s8 + $0x10] sm:$0xff] %v2138_v58   ;;  %2302 = vst [vmem:[%s2713_s8 + $0x90] sm:$0xff] %v2218_v59  }
 0x132   : > { %v970_v60 = vpop.f32.mrb[12].mxu0  ;;  %v1098_v61 = vpop.f32.mrb[12].mxu1 }
 0x133   : > { %v972_v62 = vpop.f32.mrb[13].mxu0  ;;  %v1100_v63 = vpop.f32.mrb[13].mxu1  ;;  %v1409_v2 = vadd.f32 %v2703_v18, %v970_v60  ;;  %v1441_v3 = vadd.f32 %v2703_v18, %v1098_v61 }
 0x134   : > { %v973_v0 = vpop.f32.mrb[14].mxu0  ;;  %v1101_v1 = vpop.f32.mrb[14].mxu1 }
 0x135   : > { %v1410_v4 = vadd.f32 %v2703_v18, %v973_v0  ;;  %v1442_v5 = vadd.f32 %v2703_v18, %v1101_v1  ;;  %v975_v6 = vpop.f32.mrb[15].mxu0  ;;  %v1103_v7 = vpop.f32.mrb[15].mxu1 }
 0x137   : > { %v2143_v8 = vpack.c.bf16 %v1410_v4, %v1409_v2  ;;  %v2223_v9 = vpack.c.bf16 %v1442_v5, %v1441_v3 }
 0x139   : > { %2287 = vst [vmem:[%s2713_s8 + $0x18] sm:$0xff] %v2143_v8   ;;  %2303 = vst [vmem:[%s2713_s8 + $0x98] sm:$0xff] %v2223_v9  }
 0x13a   : > { %v978_v10 = vpop.f32.mrb[16].mxu0  ;;  %v1106_v11 = vpop.f32.mrb[16].mxu1 }
 0x13b   : > { %v980_v12 = vpop.f32.mrb[17].mxu0  ;;  %v1108_v13 = vpop.f32.mrb[17].mxu1  ;;  %v1411_v16 = vadd.f32 %v2703_v18, %v978_v10  ;;  %v1443_v17 = vadd.f32 %v2703_v18, %v1106_v11 }
 0x13c   : > { %v981_v14 = vpop.f32.mrb[18].mxu0  ;;  %v1109_v15 = vpop.f32.mrb[18].mxu1 }
 0x13d   : > { %v1412_v19 = vadd.f32 %v2703_v18, %v981_v14  ;;  %v1444_v20 = vadd.f32 %v2703_v18, %v1109_v15  ;;  %v983_v21 = vpop.f32.mrb[19].mxu0  ;;  %v1111_v22 = vpop.f32.mrb[19].mxu1 }
 0x13f   : > { %v2148_v23 = vpack.c.bf16 %v1412_v19, %v1411_v16  ;;  %v2228_v24 = vpack.c.bf16 %v1444_v20, %v1443_v17 }
 0x141   : > { %2288 = vst [vmem:[%s2713_s8 + $0x20] sm:$0xff] %v2148_v23   ;;  %2304 = vst [vmem:[%s2713_s8 + $0xa0] sm:$0xff] %v2228_v24  }
 0x142   : > { %v986_v25 = vpop.f32.mrb[20].mxu0  ;;  %v1114_v26 = vpop.f32.mrb[20].mxu1 }
 0x143   : > { %v988_v27 = vpop.f32.mrb[21].mxu0  ;;  %v1116_v28 = vpop.f32.mrb[21].mxu1  ;;  %v1413_v31 = vadd.f32 %v2703_v18, %v986_v25  ;;  %v1445_v32 = vadd.f32 %v2703_v18, %v1114_v26 }
 0x144   : > { %v989_v29 = vpop.f32.mrb[22].mxu0  ;;  %v1117_v30 = vpop.f32.mrb[22].mxu1 }
 0x145   : > { %v1414_v33 = vadd.f32 %v2703_v18, %v989_v29  ;;  %v1446_v34 = vadd.f32 %v2703_v18, %v1117_v30  ;;  %v991_v35 = vpop.f32.mrb[23].mxu0  ;;  %v1119_v36 = vpop.f32.mrb[23].mxu1 }
 0x147   : > { %v2153_v37 = vpack.c.bf16 %v1414_v33, %v1413_v31  ;;  %v2233_v38 = vpack.c.bf16 %v1446_v34, %v1445_v32 }
 0x149   : > { %2289 = vst [vmem:[%s2713_s8 + $0x28] sm:$0xff] %v2153_v37   ;;  %2305 = vst [vmem:[%s2713_s8 + $0xa8] sm:$0xff] %v2233_v38  }
 0x14a   : > { %v994_v39 = vpop.f32.mrb[24].mxu0  ;;  %v1122_v40 = vpop.f32.mrb[24].mxu1 }
 0x14b   : > { %v996_v41 = vpop.f32.mrb[25].mxu0  ;;  %v1124_v42 = vpop.f32.mrb[25].mxu1  ;;  %v1415_v45 = vadd.f32 %v2703_v18, %v994_v39  ;;  %v1447_v46 = vadd.f32 %v2703_v18, %v1122_v40 }
 0x14c   : > { %v997_v43 = vpop.f32.mrb[26].mxu0  ;;  %v1125_v44 = vpop.f32.mrb[26].mxu1 }
 0x14d   : > { %v1416_v47 = vadd.f32 %v2703_v18, %v997_v43  ;;  %v1448_v48 = vadd.f32 %v2703_v18, %v1125_v44  ;;  %v999_v49 = vpop.f32.mrb[27].mxu0  ;;  %v1127_v50 = vpop.f32.mrb[27].mxu1 }
 0x14f   : > { %v2158_v51 = vpack.c.bf16 %v1416_v47, %v1415_v45  ;;  %v2238_v52 = vpack.c.bf16 %v1448_v48, %v1447_v46 }
 0x151   : > { %2290 = vst [vmem:[%s2713_s8 + $0x30] sm:$0xff] %v2158_v51   ;;  %2306 = vst [vmem:[%s2713_s8 + $0xb0] sm:$0xff] %v2238_v52  }
 0x152   : > { %v1002_v53 = vpop.f32.mrb[28].mxu0  ;;  %v1130_v54 = vpop.f32.mrb[28].mxu1 }
 0x153   : > { %v1004_v55 = vpop.f32.mrb[29].mxu0  ;;  %v1132_v56 = vpop.f32.mrb[29].mxu1  ;;  %v1417_v59 = vadd.f32 %v2703_v18, %v1002_v53  ;;  %v1449_v60 = vadd.f32 %v2703_v18, %v1130_v54 }
 0x154   : > { %v1005_v57 = vpop.f32.mrb[30].mxu0  ;;  %v1133_v58 = vpop.f32.mrb[30].mxu1 }
 0x155   : > { %v1418_v61 = vadd.f32 %v2703_v18, %v1005_v57  ;;  %v1450_v62 = vadd.f32 %v2703_v18, %v1133_v58  ;;  %v1007_v63 = vpop.f32.mrb[31].mxu0  ;;  %v1135_v0 = vpop.f32.mrb[31].mxu1 }
 0x157   : > { %v2163_v1 = vpack.c.bf16 %v1418_v61, %v1417_v59  ;;  %v2243_v2 = vpack.c.bf16 %v1450_v62, %v1449_v60 }
 0x159   : > { %2291 = vst [vmem:[%s2713_s8 + $0x38] sm:$0xff] %v2163_v1   ;;  %2307 = vst [vmem:[%s2713_s8 + $0xb8] sm:$0xff] %v2243_v2  }
 0x15a   : > { %v1010_v3 = vpop.f32.mrb[32].mxu0  ;;  %v1138_v4 = vpop.f32.mrb[32].mxu1 }
 0x15b   : > { %v1012_v5 = vpop.f32.mrb[33].mxu0  ;;  %v1140_v6 = vpop.f32.mrb[33].mxu1  ;;  %v1419_v9 = vadd.f32 %v2703_v18, %v1010_v3  ;;  %v1451_v10 = vadd.f32 %v2703_v18, %v1138_v4 }
 0x15c   : > { %v1013_v7 = vpop.f32.mrb[34].mxu0  ;;  %v1141_v8 = vpop.f32.mrb[34].mxu1 }
 0x15d   : > { %v1420_v11 = vadd.f32 %v2703_v18, %v1013_v7  ;;  %v1452_v12 = vadd.f32 %v2703_v18, %v1141_v8  ;;  %v1015_v13 = vpop.f32.mrb[35].mxu0  ;;  %v1143_v14 = vpop.f32.mrb[35].mxu1 }
 0x15f   : > { %v2168_v15 = vpack.c.bf16 %v1420_v11, %v1419_v9  ;;  %v2248_v16 = vpack.c.bf16 %v1452_v12, %v1451_v10 }
 0x161   : > { %2292 = vst [vmem:[%s2713_s8 + $0x40] sm:$0xff] %v2168_v15   ;;  %2308 = vst [vmem:[%s2713_s8 + $0xc0] sm:$0xff] %v2248_v16  }
 0x162   : > { %v1018_v17 = vpop.f32.mrb[36].mxu0  ;;  %v1146_v19 = vpop.f32.mrb[36].mxu1 }
 0x163   : > { %v1020_v20 = vpop.f32.mrb[37].mxu0  ;;  %v1148_v21 = vpop.f32.mrb[37].mxu1  ;;  %v1421_v24 = vadd.f32 %v2703_v18, %v1018_v17  ;;  %v1453_v25 = vadd.f32 %v2703_v18, %v1146_v19 }
 0x164   : > { %v1021_v22 = vpop.f32.mrb[38].mxu0  ;;  %v1149_v23 = vpop.f32.mrb[38].mxu1 }
 0x165   : > { %v1422_v26 = vadd.f32 %v2703_v18, %v1021_v22  ;;  %v1454_v27 = vadd.f32 %v2703_v18, %v1149_v23  ;;  %v1023_v28 = vpop.f32.mrb[39].mxu0  ;;  %v1151_v29 = vpop.f32.mrb[39].mxu1 }
 0x167   : > { %v2173_v30 = vpack.c.bf16 %v1422_v26, %v1421_v24  ;;  %v2253_v31 = vpack.c.bf16 %v1454_v27, %v1453_v25 }
 0x169   : > { %2293 = vst [vmem:[%s2713_s8 + $0x48] sm:$0xff] %v2173_v30   ;;  %2309 = vst [vmem:[%s2713_s8 + $0xc8] sm:$0xff] %v2253_v31  }
 0x16a   : > { %v1026_v32 = vpop.f32.mrb[40].mxu0  ;;  %v1154_v33 = vpop.f32.mrb[40].mxu1 }
 0x16b   : > { %v1028_v34 = vpop.f32.mrb[41].mxu0  ;;  %v1156_v35 = vpop.f32.mrb[41].mxu1  ;;  %v1423_v38 = vadd.f32 %v2703_v18, %v1026_v32  ;;  %v1455_v39 = vadd.f32 %v2703_v18, %v1154_v33 }
 0x16c   : > { %v1029_v36 = vpop.f32.mrb[42].mxu0  ;;  %v1157_v37 = vpop.f32.mrb[42].mxu1 }
 0x16d   : > { %v1424_v40 = vadd.f32 %v2703_v18, %v1029_v36  ;;  %v1456_v41 = vadd.f32 %v2703_v18, %v1157_v37  ;;  %v1031_v42 = vpop.f32.mrb[43].mxu0  ;;  %v1159_v43 = vpop.f32.mrb[43].mxu1 }
 0x16f   : > { %v2178_v44 = vpack.c.bf16 %v1424_v40, %v1423_v38  ;;  %v2258_v45 = vpack.c.bf16 %v1456_v41, %v1455_v39 }
 0x171   : > { %2294 = vst [vmem:[%s2713_s8 + $0x50] sm:$0xff] %v2178_v44   ;;  %2310 = vst [vmem:[%s2713_s8 + $0xd0] sm:$0xff] %v2258_v45  }
 0x172   : > { %v1034_v46 = vpop.f32.mrb[44].mxu0  ;;  %v1162_v47 = vpop.f32.mrb[44].mxu1 }
 0x173   : > { %v1036_v48 = vpop.f32.mrb[45].mxu0  ;;  %v1164_v49 = vpop.f32.mrb[45].mxu1  ;;  %v1425_v52 = vadd.f32 %v2703_v18, %v1034_v46  ;;  %v1457_v53 = vadd.f32 %v2703_v18, %v1162_v47 }
 0x174   : > { %v1037_v50 = vpop.f32.mrb[46].mxu0  ;;  %v1165_v51 = vpop.f32.mrb[46].mxu1 }
 0x175   : > { %v1426_v54 = vadd.f32 %v2703_v18, %v1037_v50  ;;  %v1458_v55 = vadd.f32 %v2703_v18, %v1165_v51  ;;  %v1039_v56 = vpop.f32.mrb[47].mxu0  ;;  %v1167_v57 = vpop.f32.mrb[47].mxu1 }
 0x177   : > { %v2183_v58 = vpack.c.bf16 %v1426_v54, %v1425_v52  ;;  %v2263_v59 = vpack.c.bf16 %v1458_v55, %v1457_v53 }
 0x179   : > { %2295 = vst [vmem:[%s2713_s8 + $0x58] sm:$0xff] %v2183_v58   ;;  %2311 = vst [vmem:[%s2713_s8 + $0xd8] sm:$0xff] %v2263_v59  }
 0x17a   : > { %v1042_v60 = vpop.f32.mrb[48].mxu0  ;;  %v1170_v61 = vpop.f32.mrb[48].mxu1 }
 0x17b   : > { %v1044_v62 = vpop.f32.mrb[49].mxu0  ;;  %v1172_v63 = vpop.f32.mrb[49].mxu1  ;;  %v1427_v2 = vadd.f32 %v2703_v18, %v1042_v60  ;;  %v1459_v3 = vadd.f32 %v2703_v18, %v1170_v61 }
 0x17c   : > { %v1045_v0 = vpop.f32.mrb[50].mxu0  ;;  %v1173_v1 = vpop.f32.mrb[50].mxu1 }
 0x17d   : > { %v1428_v4 = vadd.f32 %v2703_v18, %v1045_v0  ;;  %v1460_v5 = vadd.f32 %v2703_v18, %v1173_v1  ;;  %v1047_v6 = vpop.f32.mrb[51].mxu0  ;;  %v1175_v7 = vpop.f32.mrb[51].mxu1 }
 0x17f   : > { %v2188_v8 = vpack.c.bf16 %v1428_v4, %v1427_v2  ;;  %v2268_v9 = vpack.c.bf16 %v1460_v5, %v1459_v3 }
 0x181   : > { %2296 = vst [vmem:[%s2713_s8 + $0x60] sm:$0xff] %v2188_v8   ;;  %2312 = vst [vmem:[%s2713_s8 + $0xe0] sm:$0xff] %v2268_v9  }
 0x182   : > { %v1050_v10 = vpop.f32.mrb[52].mxu0  ;;  %v1178_v11 = vpop.f32.mrb[52].mxu1 }
 0x183   : > { %v1052_v12 = vpop.f32.mrb[53].mxu0  ;;  %v1180_v13 = vpop.f32.mrb[53].mxu1  ;;  %v1429_v16 = vadd.f32 %v2703_v18, %v1050_v10  ;;  %v1461_v17 = vadd.f32 %v2703_v18, %v1178_v11 }
 0x184   : > { %v1053_v14 = vpop.f32.mrb[54].mxu0  ;;  %v1181_v15 = vpop.f32.mrb[54].mxu1 }
 0x185   : > { %v1430_v19 = vadd.f32 %v2703_v18, %v1053_v14  ;;  %v1462_v20 = vadd.f32 %v2703_v18, %v1181_v15  ;;  %v1055_v21 = vpop.f32.mrb[55].mxu0  ;;  %v1183_v22 = vpop.f32.mrb[55].mxu1 }
 0x187   : > { %v2193_v23 = vpack.c.bf16 %v1430_v19, %v1429_v16  ;;  %v2273_v24 = vpack.c.bf16 %v1462_v20, %v1461_v17 }
 0x189   : > { %2297 = vst [vmem:[%s2713_s8 + $0x68] sm:$0xff] %v2193_v23   ;;  %2313 = vst [vmem:[%s2713_s8 + $0xe8] sm:$0xff] %v2273_v24  }
 0x18a   : > { %v1058_v25 = vpop.f32.mrb[56].mxu0  ;;  %v1186_v26 = vpop.f32.mrb[56].mxu1 }
 0x18b   : > { %v1060_v27 = vpop.f32.mrb[57].mxu0  ;;  %v1188_v28 = vpop.f32.mrb[57].mxu1  ;;  %v1431_v31 = vadd.f32 %v2703_v18, %v1058_v25  ;;  %v1463_v32 = vadd.f32 %v2703_v18, %v1186_v26 }
 0x18c   : > { %v1061_v29 = vpop.f32.mrb[58].mxu0  ;;  %v1189_v30 = vpop.f32.mrb[58].mxu1 }
 0x18d   : > { %v1432_v33 = vadd.f32 %v2703_v18, %v1061_v29  ;;  %v1464_v34 = vadd.f32 %v2703_v18, %v1189_v30  ;;  %v1063_v35 = vpop.f32.mrb[59].mxu0  ;;  %v1191_v36 = vpop.f32.mrb[59].mxu1 }
 0x18f   : > { %v2198_v37 = vpack.c.bf16 %v1432_v33, %v1431_v31  ;;  %v2278_v38 = vpack.c.bf16 %v1464_v34, %v1463_v32 }
 0x191   : > { %2298 = vst [vmem:[%s2713_s8 + $0x70] sm:$0xff] %v2198_v37   ;;  %2314 = vst [vmem:[%s2713_s8 + $0xf0] sm:$0xff] %v2278_v38  }
 0x192   : > { %v1066_v39 = vpop.f32.mrb[60].mxu0  ;;  %v1194_v40 = vpop.f32.mrb[60].mxu1 }
 0x193   : > { %v1068_v41 = vpop.f32.mrb[61].mxu0  ;;  %v1196_v42 = vpop.f32.mrb[61].mxu1  ;;  %v1433_v45 = vadd.f32 %v2703_v18, %v1066_v39  ;;  %v1465_v46 = vadd.f32 %v2703_v18, %v1194_v40 }
 0x194   : > { %v1069_v43 = vpop.f32.mrb[62].mxu0  ;;  %v1197_v44 = vpop.f32.mrb[62].mxu1 }
 0x195   : > { %v1434_v47 = vadd.f32 %v2703_v18, %v1069_v43  ;;  %v1466_v48 = vadd.f32 %v2703_v18, %v1197_v44  ;;  %v1071_v49 = vpop.f32.mrb[63].mxu0  ;;  %v1199_v50 = vpop.f32.mrb[63].mxu1 }
 0x197   : > { %v2203_v51 = vpack.c.bf16 %v1434_v47, %v1433_v45  ;;  %v2283_v52 = vpack.c.bf16 %v1466_v48, %v1465_v46 }
 0x199   : > { %2299 = vst [vmem:[%s2713_s8 + $0x78] sm:$0xff] %v2203_v51   ;;  %2315 = vst [vmem:[%s2713_s8 + $0xf8] sm:$0xff] %v2283_v52  }
 0x19a PF: > { %s13_s14 = sadd.s32 1, %s2507_s14   ;;  %s2820_s12 = smov %s2503_s13 }
 0x19b   : > { %p10_p5 = scmp.ge.s32.totalorder %s13_s14, 6   ;;  %s2821_s13 = smov %s2823_s15 }
 0x19d   :  { %12 = sbr.rel (!%p10_p5) target bundleno = 2 (0x2), region = 76 }

// kernel: discriminator_forward.5
= control target key start
LH: loop header
LB: loop body
LE: loop exit
PB: predicated region body
PF: predicated region fallthrough
CT: control target
= control target key end

     0   :  { %s1563_s12 = smov 0   ;;  %s1565_s13 = smov 0   ;;  %s1706_s0 = inlined_call_operand.vmem [shape: bf16[512,128], index: 0, kind: input, shape index: {}]   ;;  %s1707_s1 = inlined_call_operand.vmem [shape: bf16[128,128], index: 1, kind: input, shape index: {}]   ;;  %s1708_s2 = inlined_call_operand.vmem [shape: f32[1,128], index: 2, kind: input, shape index: {}]   ;;  %s1709_s3 = inlined_call_operand.vmem [shape: bf16[512,128], index: 3, kind: output, shape index: {}]  }
   0x1   :  { %s1567_s14 = smov 0  }
   0x2 LB: > { %s32_s15 = sadd.s32 1, %s1537_s13  ;;  %p1192_p0 = scmp.ge.s32.totalorder %s1541_s14, 1  ;;  %s1541_s14 = sphi %s1567_s14, %s13_s14   ;;  %s1537_s13 = sphi %s1565_s13, %s1711_s13   ;;  %s1533_s12 = sphi %s1563_s12, %s1710_s12  }
   0x3   : > { %p34_p1 = scmp.ge.s32.totalorder %s32_s15, 2  ;;  %p188_p2 = scmp.lt.s32.totalorder %s1541_s14, 3 }
   0x5   : > { %s1713_s15 = smov (%p34_p1, %s32_s15), 0  ;;  %p189_p3 = pnand %p1192_p0, %p188_p2 }
   0x6   : > { %v1495_v0 = vld [vmem:[%s1707_s1] sm:$0xff] (!%p189_p3)   ;;  %s1193_s18 = sshll.u32 (!%p189_p3), %s1533_s12, 5  ;;  %v1496_v1 = vld [vmem:[%s1707_s1 + $0x8] sm:$0xff] (!%p189_p3)   ;;  %v1497_v2 = vld [vmem:[%s1707_s1 + $0x10] sm:$0xff] (!%p189_p3)  }
   0x7   : > { %192 = sbr.rel (%p189_p3) target bundleno = 294 (0x126), region = 32  ;;  %p230_p4 = scmp.lt.s32.totalorder (!%p189_p3), %s1193_s18, 63  ;;  %1407 = vmatprep.subr.bf16.mxu0 (!%p189_p3), %v1495_v0  ;;  %1455 = vmatprep.subr.bf16.mxu1 (!%p189_p3), %v1495_v0  ;;  %v1498_v3 = vld [vmem:[%s1707_s1 + $0x18] sm:$0xff] (!%p189_p3)   ;;  %v1499_v6 = vld [vmem:[%s1707_s1 + $0x20] sm:$0xff] (!%p189_p3)   ;;  %v1500_v7 = vld [vmem:[%s1707_s1 + $0x28] sm:$0xff] (!%p189_p3)  }
   0x8   : > { %1408 = vmatpush3.bf16.msra.mxu0 (!%p189_p3), %v1495_v0  ;;  %1463 = vmatpush3.bf16.msra.mxu1 (!%p189_p3), %v1495_v0  ;;  %v1501_v8 = vld [vmem:[%s1707_s1 + $0x30] sm:$0xff] (!%p189_p3)   ;;  %v1502_v9 = vld [vmem:[%s1707_s1 + $0x38] sm:$0xff] (!%p189_p3)   ;;  %v1634_v24 = vld [vmem:[%s1708_s2] ss:$0 sm:$0xff] (!%p189_p3) }
   0x9   : > { %1409 = vmatprep.subr.bf16.mxu0 (!%p189_p3), %v1496_v1  ;;  %1456 = vmatprep.subr.bf16.mxu1 (!%p189_p3), %v1496_v1 }
   0xc   : > { %1410 = vmatpush3.bf16.msra.mxu0 (!%p189_p3), %v1496_v1  ;;  %1464 = vmatpush3.bf16.msra.mxu1 (!%p189_p3), %v1496_v1 }
   0xd   : > { %1411 = vmatprep.subr.bf16.mxu0 (!%p189_p3), %v1497_v2  ;;  %1457 = vmatprep.subr.bf16.mxu1 (!%p189_p3), %v1497_v2 }
   0xe   : > { %s1715_s18 = smov (!%p230_p4, %s1193_s18), 63 }
   0xf   : > { %s1194_s23 = sshll.u32 %s1715_s18, 2 }
  0x10   : > { %s1598_s26 = scalar_lea.vmem %s1706_s0, %s1194_s23  ;;  %1412 = vmatpush3.bf16.msra.mxu0 %v1497_v2  ;;  %1465 = vmatpush3.bf16.msra.mxu1 %v1497_v2  ;;  %s1651_s17 = scalar_lea.vmem %s1709_s3, %s1194_s23 }
  0x11   : > { %v1503_v4 = vld [vmem:[%s1598_s26] sm:$0xff]   ;;  %1413 = vmatprep.subr.bf16.mxu0 %v1498_v3  ;;  %1458 = vmatprep.subr.bf16.mxu1 %v1498_v3  ;;  %v1505_v10 = vld [vmem:[%s1598_s26 + $0x8] sm:$0xff]   ;;  %v1507_v12 = vld [vmem:[%s1598_s26 + $0x10] sm:$0xff]  }
  0x12   : > { %v1504_v5 = vld [vmem:[%s1598_s26 + $0x40] sm:$0xff]   ;;  %1423 = vmatprep.mubr.bf16.mxu0 %v1503_v4  ;;  %v1506_v11 = vld [vmem:[%s1598_s26 + $0x48] sm:$0xff]   ;;  %v1508_v13 = vld [vmem:[%s1598_s26 + $0x50] sm:$0xff]  }
  0x13   : > { %1439 = vmatprep.mubr.bf16.mxu1 %v1504_v5  ;;  %v1509_v14 = vld [vmem:[%s1598_s26 + $0x18] sm:$0xff]   ;;  %v1511_v16 = vld [vmem:[%s1598_s26 + $0x20] sm:$0xff]   ;;  %v1513_v18 = vld [vmem:[%s1598_s26 + $0x28] sm:$0xff]  }
  0x14   : > { %1414 = vmatpush3.bf16.msra.mxu0 %v1498_v3  ;;  %1466 = vmatpush3.bf16.msra.mxu1 %v1498_v3  ;;  %v1510_v15 = vld [vmem:[%s1598_s26 + $0x58] sm:$0xff]   ;;  %v1512_v17 = vld [vmem:[%s1598_s26 + $0x60] sm:$0xff]   ;;  %v1514_v19 = vld [vmem:[%s1598_s26 + $0x68] sm:$0xff]  }
  0x15   : > { %1415 = vmatprep.subr.bf16.mxu0 %v1499_v6  ;;  %1459 = vmatprep.subr.bf16.mxu1 %v1499_v6  ;;  %v1515_v20 = vld [vmem:[%s1598_s26 + $0x30] sm:$0xff]   ;;  %v1517_v22 = vld [vmem:[%s1598_s26 + $0x38] sm:$0xff]  }
  0x16   : > { %v1516_v21 = vld [vmem:[%s1598_s26 + $0x70] sm:$0xff]   ;;  %v1518_v23 = vld [vmem:[%s1598_s26 + $0x78] sm:$0xff]  }
  0x18   : > { %1416 = vmatpush3.bf16.msra.mxu0 %v1499_v6  ;;  %1467 = vmatpush3.bf16.msra.mxu1 %v1499_v6 }
  0x19   : > { %1417 = vmatprep.subr.bf16.mxu0 %v1500_v7  ;;  %1460 = vmatprep.subr.bf16.mxu1 %v1500_v7 }
  0x1c   : > { %1418 = vmatpush3.bf16.msra.mxu0 %v1500_v7  ;;  %1468 = vmatpush3.bf16.msra.mxu1 %v1500_v7 }
  0x1d   : > { %1419 = vmatprep.subr.bf16.mxu0 %v1501_v8  ;;  %1461 = vmatprep.subr.bf16.mxu1 %v1501_v8 }
  0x20   : > { %1420 = vmatpush3.bf16.msra.mxu0 %v1501_v8  ;;  %1469 = vmatpush3.bf16.msra.mxu1 %v1501_v8 }
  0x21   : > { %1421 = vmatprep.subr.bf16.mxu0 %v1502_v9  ;;  %1462 = vmatprep.subr.bf16.mxu1 %v1502_v9 }
  0x24   : > { %1422 = vmatpush3.bf16.msra.mxu0 %v1502_v9  ;;  %1470 = vmatpush3.bf16.msra.mxu1 %v1502_v9 }
  0x27   : > { %1424 = vmatmul.mubr.bf16.vlgmr.msra.gmra.mrb[0].mxu0 %v1505_v10  ;;  %1440 = vmatmul.mubr.bf16.vlgmr.msra.gmra.mrb[0].mxu1 %v1506_v11 }
  0x28   : > { %1427 = vmatprep.mubr.bf16.mxu0 %v1507_v12  ;;  %1443 = vmatprep.mubr.bf16.mxu1 %v1508_v13 }
  0x2f   : > { %1428 = vmatmul.mubr.bf16.gmra.mrb[4].mxu0 %v1509_v14  ;;  %1444 = vmatmul.mubr.bf16.gmra.mrb[4].mxu1 %v1510_v15 }
  0x30   : > { %1431 = vmatprep.mubr.bf16.mxu0 %v1511_v16  ;;  %1447 = vmatprep.mubr.bf16.mxu1 %v1512_v17 }
  0x37   : > { %1432 = vmatmul.mubr.bf16.gmra.mrb[8].mxu0 %v1513_v18  ;;  %1448 = vmatmul.mubr.bf16.gmra.mrb[8].mxu1 %v1514_v19 }
  0x38   : > { %1435 = vmatprep.mubr.bf16.mxu0 %v1515_v20  ;;  %1451 = vmatprep.mubr.bf16.mxu1 %v1516_v21 }
  0x3f   : > { %1436 = vmatmul.mubr.bf16.gmra.mrb[12].mxu0 %v1517_v22  ;;  %1452 = vmatmul.mubr.bf16.gmra.mrb[12].mxu1 %v1518_v23 }
  0xfa   : > { %v1425_v25 = vpop.f32.mrb[0].mxu0  ;;  %v1441_v26 = vpop.f32.mrb[0].mxu1 }
  0xfb   : > { %v789_v27 = vadd.f32 %v1425_v25, %v1634_v24  ;;  %v805_v28 = vadd.f32 %v1441_v26, %v1634_v24  ;;  %v554_v29 = vpop.f32.mrb[1].mxu0  ;;  %v618_v30 = vpop.f32.mrb[1].mxu1 }
  0xfc   : > { %v787_v31 = vadd.f32 %v1634_v24, %v554_v29  ;;  %v803_v32 = vadd.f32 %v1634_v24, %v618_v30  ;;  %v1426_v33 = vpop.f32.mrb[2].mxu0  ;;  %v1442_v34 = vpop.f32.mrb[2].mxu1 }
  0xfd   : > { %vm821_vm0 = vcmp.gt.f32.partialorder %v789_v27, 0.0  ;;  %v853_v35 = vmul.f32 0.2, %v789_v27  ;;  %vm837_vm1 = vcmp.gt.f32.partialorder %v805_v28, 0.0  ;;  %v869_v36 = vmul.f32 0.2, %v805_v28 }
  0xfe   : > { %vm819_vm2 = vcmp.gt.f32.partialorder %v787_v31, 0.0  ;;  %v851_v37 = vmul.f32 0.2, %v787_v31  ;;  %vm835_vm3 = vcmp.gt.f32.partialorder %v803_v32, 0.0  ;;  %v867_v38 = vmul.f32 0.2, %v803_v32 }
  0xff   : > { %v790_v39 = vadd.f32 %v1426_v33, %v1634_v24  ;;  %v806_v40 = vadd.f32 %v1442_v34, %v1634_v24  ;;  %v557_v41 = vpop.f32.mrb[3].mxu0  ;;  %v621_v42 = vpop.f32.mrb[3].mxu1  ;;  %v885_v43 = vsel %vm821_vm0, %v789_v27, %v853_v35  ;;  %v901_v44 = vsel %vm837_vm1, %v805_v28, %v869_v36 }
 0x100   : > { %v788_v45 = vadd.f32 %v1634_v24, %v557_v41  ;;  %v804_v46 = vadd.f32 %v1634_v24, %v621_v42  ;;  %v883_v51 = vsel %vm819_vm2, %v787_v31, %v851_v37  ;;  %v899_v52 = vsel %vm835_vm3, %v803_v32, %v867_v38 }
 0x101   : > { %vm822_vm4 = vcmp.gt.f32.partialorder %v790_v39, 0.0  ;;  %v854_v47 = vmul.f32 0.2, %v790_v39  ;;  %vm838_vm5 = vcmp.gt.f32.partialorder %v806_v40, 0.0  ;;  %v870_v48 = vmul.f32 0.2, %v806_v40 }
 0x102   : > { %vm820_vm6 = vcmp.gt.f32.partialorder %v788_v45, 0.0  ;;  %v852_v49 = vmul.f32 0.2, %v788_v45  ;;  %vm836_vm7 = vcmp.gt.f32.partialorder %v804_v46, 0.0  ;;  %v868_v50 = vmul.f32 0.2, %v804_v46 }
 0x103   : > { %v886_v53 = vsel %vm822_vm4, %v790_v39, %v854_v47  ;;  %v902_v54 = vsel %vm838_vm5, %v806_v40, %v870_v48  ;;  %v1429_v55 = vpop.f32.mrb[4].mxu0  ;;  %v1445_v56 = vpop.f32.mrb[4].mxu1 }
 0x104   : > { %v1296_v57 = vpack.c.bf16 %v886_v53, %v885_v43  ;;  %v1336_v58 = vpack.c.bf16 %v902_v54, %v901_v44  ;;  %v884_v59 = vsel %vm820_vm6, %v788_v45, %v852_v49  ;;  %v900_v60 = vsel %vm836_vm7, %v804_v46, %v868_v50  ;;  %v570_v61 = vpop.f32.mrb[5].mxu0  ;;  %v634_v62 = vpop.f32.mrb[5].mxu1 }
 0x105   : > { %v1291_v63 = vpack.c.bf16 %v884_v59, %v883_v51  ;;  %v1331_v0 = vpack.c.bf16 %v900_v60, %v899_v52  ;;  %v793_v1 = vadd.f32 %v1429_v55, %v1634_v24  ;;  %v809_v2 = vadd.f32 %v1445_v56, %v1634_v24  ;;  %v1430_v3 = vpop.f32.mrb[6].mxu0  ;;  %v1446_v4 = vpop.f32.mrb[6].mxu1 }
 0x106   : > { %1368 = vst [vmem:[%s1651_s17 + $0x8] sm:$0xff] %v1296_v57   ;;  %1376 = vst [vmem:[%s1651_s17 + $0x48] sm:$0xff] %v1336_v58   ;;  %v791_v5 = vadd.f32 %v1634_v24, %v570_v61  ;;  %v807_v6 = vadd.f32 %v1634_v24, %v634_v62  ;;  %v794_v7 = vadd.f32 %v1430_v3, %v1634_v24  ;;  %v573_v9 = vpop.f32.mrb[7].mxu0  ;;  %v637_v10 = vpop.f32.mrb[7].mxu1 }
 0x107   : > { %v810_v8 = vadd.f32 %v1446_v4, %v1634_v24  ;;  %1292 = vst [vmem:[%s1651_s17] sm:$0xff] %v1291_v63   ;;  %1375 = vst [vmem:[%s1651_s17 + $0x40] sm:$0xff] %v1331_v0   ;;  %vm825_vm8 = vcmp.gt.f32.partialorder %v793_v1, 0.0  ;;  %v857_v11 = vmul.f32 0.2, %v793_v1  ;;  %vm841_vm9 = vcmp.gt.f32.partialorder %v809_v2, 0.0 }
 0x108   : > { %v873_v12 = vmul.f32 0.2, %v809_v2  ;;  %vm823_vm10 = vcmp.gt.f32.partialorder %v791_v5, 0.0  ;;  %v855_v13 = vmul.f32 0.2, %v791_v5  ;;  %vm839_vm11 = vcmp.gt.f32.partialorder %v807_v6, 0.0 }
 0x109   : > { %v889_v14 = vsel %vm825_vm8, %v793_v1, %v857_v11  ;;  %v871_v15 = vmul.f32 0.2, %v807_v6  ;;  %vm826_vm12 = vcmp.gt.f32.partialorder %v794_v7, 0.0  ;;  %v858_v16 = vmul.f32 0.2, %v794_v7 }
 0x10a   : > { %v905_v17 = vsel %vm841_vm9, %v809_v2, %v873_v12  ;;  %v887_v18 = vsel %vm823_vm10, %v791_v5, %v855_v13  ;;  %vm842_vm13 = vcmp.gt.f32.partialorder %v810_v8, 0.0  ;;  %v874_v19 = vmul.f32 0.2, %v810_v8  ;;  %v1433_v20 = vpop.f32.mrb[8].mxu0  ;;  %v1449_v21 = vpop.f32.mrb[8].mxu1 }
 0x10b   : > { %v890_v22 = vsel %vm826_vm12, %v794_v7, %v858_v16  ;;  %v792_v23 = vadd.f32 %v1634_v24, %v573_v9  ;;  %v808_v25 = vadd.f32 %v1634_v24, %v637_v10  ;;  %v797_v26 = vadd.f32 %v1433_v20, %v1634_v24  ;;  %v586_v27 = vpop.f32.mrb[9].mxu0  ;;  %v650_v28 = vpop.f32.mrb[9].mxu1 }
 0x10c   : > { %v1306_v29 = vpack.c.bf16 %v890_v22, %v889_v14  ;;  %v906_v30 = vsel %vm842_vm13, %v810_v8, %v874_v19  ;;  %v813_v31 = vadd.f32 %v1449_v21, %v1634_v24  ;;  %v795_v32 = vadd.f32 %v1634_v24, %v586_v27  ;;  %v1434_v33 = vpop.f32.mrb[10].mxu0  ;;  %v1450_v34 = vpop.f32.mrb[10].mxu1 }
 0x10d   : > { %v1346_v35 = vpack.c.bf16 %v906_v30, %v905_v17  ;;  %vm824_vm14 = vcmp.gt.f32.partialorder %v792_v23, 0.0  ;;  %v856_v36 = vmul.f32 0.2, %v792_v23  ;;  %vm840_vm15 = vcmp.gt.f32.partialorder %v808_v25, 0.0  ;;  %v589_v37 = vpop.f32.mrb[11].mxu0  ;;  %v653_v38 = vpop.f32.mrb[11].mxu1 }
 0x10e   : > { %1370 = vst [vmem:[%s1651_s17 + $0x18] sm:$0xff] %v1306_v29   ;;  %v872_v39 = vmul.f32 0.2, %v808_v25  ;;  %vm829_vm0 = vcmp.gt.f32.partialorder %v797_v26, 0.0  ;;  %v861_v40 = vmul.f32 0.2, %v797_v26  ;;  %v903_v41 = vsel %vm839_vm11, %v807_v6, %v871_v15 }
 0x10f   : > { %vm845_vm1 = vcmp.gt.f32.partialorder %v813_v31, 0.0  ;;  %1378 = vst [vmem:[%s1651_s17 + $0x58] sm:$0xff] %v1346_v35   ;;  %v888_v42 = vsel %vm824_vm14, %v792_v23, %v856_v36  ;;  %v877_v43 = vmul.f32 0.2, %v813_v31  ;;  %vm827_vm2 = vcmp.gt.f32.partialorder %v795_v32, 0.0 }
 0x110   : > { %v1301_v44 = vpack.c.bf16 %v888_v42, %v887_v18  ;;  %v904_v45 = vsel %vm840_vm15, %v808_v25, %v872_v39  ;;  %v859_v46 = vmul.f32 0.2, %v795_v32  ;;  %v811_v47 = vadd.f32 %v1634_v24, %v650_v28 }
 0x111   : > { %v1341_v48 = vpack.c.bf16 %v904_v45, %v903_v41  ;;  %v893_v49 = vsel %vm829_vm0, %v797_v26, %v861_v40  ;;  %v909_v50 = vsel %vm845_vm1, %v813_v31, %v877_v43  ;;  %v798_v51 = vadd.f32 %v1434_v33, %v1634_v24 }
 0x112   : > { %1369 = vst [vmem:[%s1651_s17 + $0x10] sm:$0xff] %v1301_v44   ;;  %vm843_vm3 = vcmp.gt.f32.partialorder %v811_v47, 0.0  ;;  %v875_v52 = vmul.f32 0.2, %v811_v47  ;;  %v814_v53 = vadd.f32 %v1450_v34, %v1634_v24  ;;  %v796_v54 = vadd.f32 %v1634_v24, %v589_v37  ;;  %v1437_v55 = vpop.f32.mrb[12].mxu0  ;;  %v1453_v56 = vpop.f32.mrb[12].mxu1 }
 0x113   : > { %1377 = vst [vmem:[%s1651_s17 + $0x50] sm:$0xff] %v1341_v48   ;;  %vm830_vm4 = vcmp.gt.f32.partialorder %v798_v51, 0.0  ;;  %v862_v57 = vmul.f32 0.2, %v798_v51  ;;  %v812_v58 = vadd.f32 %v1634_v24, %v653_v38  ;;  %v801_v59 = vadd.f32 %v1437_v55, %v1634_v24  ;;  %v602_v60 = vpop.f32.mrb[13].mxu0  ;;  %v666_v61 = vpop.f32.mrb[13].mxu1 }
 0x114   : > { %v891_v62 = vsel %vm827_vm2, %v795_v32, %v859_v46  ;;  %vm846_vm5 = vcmp.gt.f32.partialorder %v814_v53, 0.0  ;;  %v878_v63 = vmul.f32 0.2, %v814_v53  ;;  %vm828_vm6 = vcmp.gt.f32.partialorder %v796_v54, 0.0  ;;  %v1438_v0 = vpop.f32.mrb[14].mxu0  ;;  %v1454_v1 = vpop.f32.mrb[14].mxu1 }
 0x115   : > { %v894_v2 = vsel %vm830_vm4, %v798_v51, %v862_v57  ;;  %v860_v3 = vmul.f32 0.2, %v796_v54  ;;  %vm844_vm7 = vcmp.gt.f32.partialorder %v812_v58, 0.0  ;;  %v876_v4 = vmul.f32 0.2, %v812_v58  ;;  %v605_v5 = vpop.f32.mrb[15].mxu0 }
 0x116   : > { %v907_v6 = vsel %vm843_vm3, %v811_v47, %v875_v52  ;;  %v1316_v7 = vpack.c.bf16 %v894_v2, %v893_v49  ;;  %v910_v8 = vsel %vm846_vm5, %v814_v53, %v878_v63  ;;  %v865_v9 = vmul.f32 0.2, %v801_v59  ;;  %v669_v10 = vpop.f32.mrb[15].mxu1 }
 0x117   : > { %v1356_v11 = vpack.c.bf16 %v910_v8, %v909_v50  ;;  %v892_v12 = vsel %vm828_vm6, %v796_v54, %v860_v3  ;;  %v908_v13 = vsel %vm844_vm7, %v812_v58, %v876_v4  ;;  %v817_v14 = vadd.f32 %v1453_v56, %v1634_v24 }
 0x118   : > { %1372 = vst [vmem:[%s1651_s17 + $0x28] sm:$0xff] %v1316_v7   ;;  %v1311_v15 = vpack.c.bf16 %v892_v12, %v891_v62  ;;  %v1351_v16 = vpack.c.bf16 %v908_v13, %v907_v6  ;;  %vm833_vm8 = vcmp.gt.f32.partialorder %v801_v59, 0.0  ;;  %v799_v17 = vadd.f32 %v1634_v24, %v602_v60 }
 0x119   : > { %1380 = vst [vmem:[%s1651_s17 + $0x68] sm:$0xff] %v1356_v11   ;;  %vm849_vm9 = vcmp.gt.f32.partialorder %v817_v14, 0.0  ;;  %v881_v18 = vmul.f32 0.2, %v817_v14  ;;  %v815_v19 = vadd.f32 %v1634_v24, %v666_v61  ;;  %v802_v20 = vadd.f32 %v1438_v0, %v1634_v24 }
 0x11a   : > { %1371 = vst [vmem:[%s1651_s17 + $0x20] sm:$0xff] %v1311_v15   ;;  %1379 = vst [vmem:[%s1651_s17 + $0x60] sm:$0xff] %v1351_v16   ;;  %v863_v21 = vmul.f32 0.2, %v799_v17  ;;  %v818_v22 = vadd.f32 %v1454_v1, %v1634_v24  ;;  %v800_v23 = vadd.f32 %v1634_v24, %v605_v5  ;;  %v897_v25 = vsel %vm833_vm8, %v801_v59, %v865_v9 }
 0x11b   : > { %vm831_vm10 = vcmp.gt.f32.partialorder %v799_v17, 0.0  ;;  %vm834_vm11 = vcmp.gt.f32.partialorder %v802_v20, 0.0  ;;  %v913_v26 = vsel %vm849_vm9, %v817_v14, %v881_v18  ;;  %v866_v27 = vmul.f32 0.2, %v802_v20 }
 0x11c   : > { %vm850_vm12 = vcmp.gt.f32.partialorder %v818_v22, 0.0  ;;  %v882_v28 = vmul.f32 0.2, %v818_v22  ;;  %vm847_vm13 = vcmp.gt.f32.partialorder %v815_v19, 0.0  ;;  %vm832_vm14 = vcmp.gt.f32.partialorder %v800_v23, 0.0 }
 0x11d   : > { %v864_v29 = vmul.f32 0.2, %v800_v23  ;;  %v816_v30 = vadd.f32 %v1634_v24, %v669_v10  ;;  %v895_v31 = vsel %vm831_vm10, %v799_v17, %v863_v21  ;;  %v879_v32 = vmul.f32 0.2, %v815_v19 }
 0x11e   : > { %v898_v33 = vsel %vm834_vm11, %v802_v20, %v866_v27  ;;  %v914_v34 = vsel %vm850_vm12, %v818_v22, %v882_v28 }
 0x11f   : > { %v1326_v35 = vpack.c.bf16 %v898_v33, %v897_v25  ;;  %v1366_v36 = vpack.c.bf16 %v914_v34, %v913_v26  ;;  %v896_v37 = vsel %vm832_vm14, %v800_v23, %v864_v29  ;;  %vm848_vm15 = vcmp.gt.f32.partialorder %v816_v30, 0.0 }
 0x120   : > { %v1321_v38 = vpack.c.bf16 %v896_v37, %v895_v31  ;;  %v880_v39 = vmul.f32 0.2, %v816_v30  ;;  %v911_v40 = vsel %vm847_vm13, %v815_v19, %v879_v32 }
 0x121   : > { %1374 = vst [vmem:[%s1651_s17 + $0x38] sm:$0xff] %v1326_v35   ;;  %1382 = vst [vmem:[%s1651_s17 + $0x78] sm:$0xff] %v1366_v36  }
 0x122   : > { %1373 = vst [vmem:[%s1651_s17 + $0x30] sm:$0xff] %v1321_v38   ;;  %v912_v41 = vsel %vm848_vm15, %v816_v30, %v880_v39 }
 0x123   : > { %v1361_v42 = vpack.c.bf16 %v912_v41, %v911_v40 }
 0x125   : > { %1381 = vst [vmem:[%s1651_s17 + $0x70] sm:$0xff] %v1361_v42  }
 0x126 PF: > { %s13_s14 = sadd.s32 1, %s1541_s14   ;;  %s1710_s12 = smov %s1537_s13 }
 0x127   : > { %p10_p5 = scmp.ge.s32.totalorder %s13_s14, 4   ;;  %s1711_s13 = smov %s1713_s15 }
 0x129   :  { %12 = sbr.rel (!%p10_p5) target bundleno = 2 (0x2), region = 76 }

// kernel: discriminator_forward.6
= control target key start
LH: loop header
LB: loop body
LE: loop exit
PB: predicated region body
PF: predicated region fallthrough
CT: control target
= control target key end

     0   :  { %s1033_s12 = smov 0   ;;  %s1035_s13 = smov 0   ;;  %s1139_s0 = inlined_call_operand.vmem [shape: bf16[2,64,256], index: 0, kind: input, shape index: {}]   ;;  %s1140_s1 = inlined_call_operand.vmem [shape: bf16[256,128], index: 1, kind: input, shape index: {}]   ;;  %s1141_s2 = inlined_call_operand.vmem [shape: f32[1,128], index: 2, kind: input, shape index: {}]   ;;  %s1142_s3 = inlined_call_operand.vmem [shape: bf16[2,64,128], index: 3, kind: output, shape index: {}]  }
   0x1   :  { %s1037_s14 = smov 0  }
   0x2 LB: > { %s32_s15 = sadd.s32 1, %s1007_s13  ;;  %p806_p0 = scmp.ge.s32.totalorder %s1011_s14, 1  ;;  %s1011_s14 = sphi %s1037_s14, %s13_s14   ;;  %s1007_s13 = sphi %s1035_s13, %s1144_s13   ;;  %s1003_s12 = sphi %s1033_s12, %s1143_s12  }
   0x3   : > { %p34_p1 = scmp.ge.s32.totalorder %s32_s15, 2  ;;  %p189_p2 = scmp.lt.s32.totalorder %s1011_s14, 3 }
   0x5   : > { %s1146_s15 = smov (%p34_p1, %s32_s15), 0  ;;  %p190_p3 = pnand %p806_p0, %p189_p2 }
   0x6   : > { %v959_v0 = vld [vmem:[%s1140_s1 + $0x40] sm:$0xff] (!%p190_p3)   ;;  %v961_v2 = vld [vmem:[%s1140_s1 + $0x48] sm:$0xff] (!%p190_p3)   ;;  %p232_p4 = scmp.lt.s32.totalorder (!%p190_p3), %s1003_s12, 1  ;;  %v963_v4 = vld [vmem:[%s1140_s1 + $0x50] sm:$0xff] (!%p190_p3)  }
   0x7   : > { %193 = sbr.rel (%p190_p3) target bundleno = 347 (0x15b), region = 32  ;;  %v960_v1 = vld [vmem:[%s1140_s1] sm:$0xff] (!%p190_p3)   ;;  %879 = vmatprep.subr.bf16.mxu0 (!%p190_p3), %v959_v0  ;;  %919 = vmatprep.subr.bf16.mxu1 (!%p190_p3), %v959_v0  ;;  %v962_v3 = vld [vmem:[%s1140_s1 + $0x8] sm:$0xff] (!%p190_p3)   ;;  %v964_v5 = vld [vmem:[%s1140_s1 + $0x10] sm:$0xff] (!%p190_p3)  }
   0x8   : > { %880 = vmatpush3.bf16.msra.mxu0 (!%p190_p3), %v960_v1  ;;  %927 = vmatpush3.bf16.msra.mxu1 (!%p190_p3), %v960_v1  ;;  %v965_v6 = vld [vmem:[%s1140_s1 + $0x58] sm:$0xff] (!%p190_p3)   ;;  %v967_v8 = vld [vmem:[%s1140_s1 + $0x60] sm:$0xff] (!%p190_p3)   ;;  %v969_v10 = vld [vmem:[%s1140_s1 + $0x68] sm:$0xff] (!%p190_p3)  }
   0x9   : > { %881 = vmatprep.subr.bf16.mxu0 (!%p190_p3), %v961_v2  ;;  %920 = vmatprep.subr.bf16.mxu1 (!%p190_p3), %v961_v2  ;;  %v966_v7 = vld [vmem:[%s1140_s1 + $0x18] sm:$0xff] (!%p190_p3)   ;;  %v968_v9 = vld [vmem:[%s1140_s1 + $0x20] sm:$0xff] (!%p190_p3)   ;;  %v970_v13 = vld [vmem:[%s1140_s1 + $0x28] sm:$0xff] (!%p190_p3)  }
   0xa   : > { %v971_v14 = vld [vmem:[%s1140_s1 + $0x70] sm:$0xff] (!%p190_p3)   ;;  %v973_v16 = vld [vmem:[%s1140_s1 + $0x78] sm:$0xff] (!%p190_p3)   ;;  %v835_v32 = vld [vmem:[%s1141_s2] ss:$0 sm:$0xff] (!%p190_p3) }
   0xb   : > { %v972_v15 = vld [vmem:[%s1140_s1 + $0x30] sm:$0xff] (!%p190_p3)   ;;  %v974_v17 = vld [vmem:[%s1140_s1 + $0x38] sm:$0xff] (!%p190_p3)  }
   0xc   : > { %882 = vmatpush3.bf16.msra.mxu0 (!%p190_p3), %v962_v3  ;;  %928 = vmatpush3.bf16.msra.mxu1 (!%p190_p3), %v962_v3 }
   0xd   : > { %883 = vmatprep.subr.bf16.mxu0 (!%p190_p3), %v963_v4  ;;  %921 = vmatprep.subr.bf16.mxu1 (!%p190_p3), %v963_v4 }
   0xe   : > { %s1148_s12 = smov (!%p232_p4, %s1003_s12), 1 }
   0xf   : > { %s846_s5 = sshll.u32 %s1148_s12, 6  ;;  %s847_s4 = sshll.u32 %s1148_s12, 5 }
  0x10   : > { %884 = vmatpush3.bf16.msra.mxu0 %v964_v5  ;;  %929 = vmatpush3.bf16.msra.mxu1 %v964_v5  ;;  %s1084_s10 = scalar_lea.vmem %s1139_s0, %s846_s5  ;;  %s260_s12 = scalar_lea.vmem %s1142_s3, %s847_s4 }
  0x11   : > { %885 = vmatprep.subr.bf16.mxu0 %v965_v6  ;;  %922 = vmatprep.subr.bf16.mxu1 %v965_v6  ;;  %v977_v11 = vld [vmem:[%s1084_s10 + $0x4] ss:$8 sps:$4 sm:$0xff]   ;;  %v975_v18 = vld [vmem:[%s1084_s10] ss:$8 sps:$4 sm:$0xff]   ;;  %v981_v20 = vld [vmem:[%s1084_s10 + $0x14] ss:$8 sps:$4 sm:$0xff]  }
  0x12   : > { %v980_v12 = vld [vmem:[%s1084_s10 + $0x24] ss:$8 sps:$4 sm:$0xff]   ;;  %490 = vmatprep.mubr.bf16.mxu0 %v977_v11  ;;  %v978_v19 = vld [vmem:[%s1084_s10 + $0x20] ss:$8 sps:$4 sm:$0xff]   ;;  %v984_v21 = vld [vmem:[%s1084_s10 + $0x34] ss:$8 sps:$4 sm:$0xff]  }
  0x13   : > { %506 = vmatprep.mubr.bf16.mxu1 %v980_v12  ;;  %v983_v22 = vld [vmem:[%s1084_s10 + $0x10] ss:$8 sps:$4 sm:$0xff]  }
  0x14   : > { %886 = vmatpush3.bf16.msra.mxu0 %v966_v7  ;;  %930 = vmatpush3.bf16.msra.mxu1 %v966_v7  ;;  %v986_v23 = vld [vmem:[%s1084_s10 + $0x30] ss:$8 sps:$4 sm:$0xff]  }
  0x15   : > { %887 = vmatprep.subr.bf16.mxu0 %v967_v8  ;;  %923 = vmatprep.subr.bf16.mxu1 %v967_v8 }
  0x18   : > { %888 = vmatpush3.bf16.msra.mxu0 %v968_v9  ;;  %931 = vmatpush3.bf16.msra.mxu1 %v968_v9 }
  0x19   : > { %889 = vmatprep.subr.bf16.mxu0 %v969_v10  ;;  %924 = vmatprep.subr.bf16.mxu1 %v969_v10 }
  0x1c   : > { %890 = vmatpush3.bf16.msra.mxu0 %v970_v13  ;;  %932 = vmatpush3.bf16.msra.mxu1 %v970_v13 }
  0x1d   : > { %891 = vmatprep.subr.bf16.mxu0 %v971_v14  ;;  %925 = vmatprep.subr.bf16.mxu1 %v971_v14 }
  0x20   : > { %892 = vmatpush3.bf16.msra.mxu0 %v972_v15  ;;  %933 = vmatpush3.bf16.msra.mxu1 %v972_v15 }
  0x21   : > { %893 = vmatprep.subr.bf16.mxu0 %v973_v16  ;;  %926 = vmatprep.subr.bf16.mxu1 %v973_v16 }
  0x24   : > { %894 = vmatpush3.bf16.msra.mxu0 %v974_v17  ;;  %934 = vmatpush3.bf16.msra.mxu1 %v974_v17 }
  0x27   : > { %491 = vmatmul.mubr.bf16.vlgmr.msra.gmra.mrb[0].mxu0 %v975_v18  ;;  %507 = vmatmul.mubr.bf16.vlgmr.msra.gmra.mrb[0].mxu1 %v978_v19 }
  0x28   : > { %498 = vmatprep.mubr.bf16.mxu0 %v981_v20  ;;  %514 = vmatprep.mubr.bf16.mxu1 %v984_v21 }
  0x2f   : > { %499 = vmatmul.mubr.bf16.gmra.mrb[4].mxu0 %v983_v22  ;;  %515 = vmatmul.mubr.bf16.gmra.mrb[4].mxu1 %v986_v23 }
  0xfa   : > { %v895_v24 = vpop.f32.mrb[0].mxu0  ;;  %v907_v25 = vpop.f32.mrb[0].mxu1 }
  0xfb   : > { %v896_v26 = vpop.f32.mrb[1].mxu0  ;;  %v908_v27 = vpop.f32.mrb[1].mxu1 }
  0xfc   : > { %v897_v28 = vadd.f32 %v896_v26, %v895_v24  ;;  %v898_v29 = vpop.f32.mrb[2].mxu0  ;;  %v909_v30 = vadd.f32 %v908_v27, %v907_v25  ;;  %v910_v31 = vpop.f32.mrb[2].mxu1 }
  0xfd   : > { %v899_v33 = vpop.f32.mrb[3].mxu0  ;;  %v911_v34 = vpop.f32.mrb[3].mxu1 }
  0xfe   : > { %v900_v35 = vadd.f32 %v899_v33, %v898_v29  ;;  %v912_v36 = vadd.f32 %v911_v34, %v910_v31  ;;  %v557_v37 = vadd.f32 %v897_v28, %v835_v32  ;;  %v561_v55 = vadd.f32 %v909_v30, %v835_v32 }
 0x100   : > { %v558_v38 = vadd.f32 %v900_v35, %v835_v32  ;;  %v562_v57 = vadd.f32 %v912_v36, %v835_v32 }
 0x102   : > { %v565_v39 = vadd.f32 %v558_v38, %v557_v37  ;;  %v901_v40 = vpop.f32.mrb[4].mxu0  ;;  %v913_v41 = vpop.f32.mrb[4].mxu1 }
 0x103   : > { %v902_v42 = vpop.f32.mrb[5].mxu0  ;;  %v914_v43 = vpop.f32.mrb[5].mxu1 }
 0x104   : > { %v903_v44 = vadd.f32 %v902_v42, %v901_v40  ;;  %v904_v45 = vpop.f32.mrb[6].mxu0  ;;  %v915_v46 = vadd.f32 %v914_v43, %v913_v41  ;;  %v916_v47 = vpop.f32.mrb[6].mxu1 }
 0x105   : > { %v905_v48 = vpop.f32.mrb[7].mxu0  ;;  %v917_v49 = vpop.f32.mrb[7].mxu1 }
 0x106   : > { %v559_v50 = vadd.f32 %v903_v44, %v835_v32  ;;  %v906_v51 = vadd.f32 %v905_v48, %v904_v45  ;;  %v918_v52 = vadd.f32 %v917_v49, %v916_v47  ;;  %v563_v59 = vadd.f32 %v915_v46, %v835_v32 }
 0x108   : > { %v566_v53 = vadd.f32 %v565_v39, %v559_v50  ;;  %v560_v54 = vadd.f32 %v906_v51, %v835_v32  ;;  %v564_v62 = vadd.f32 %v918_v52, %v835_v32 }
 0x10a   : > { %v567_v56 = vadd.f32 %v566_v53, %v560_v54 }
 0x10c   : > { %v568_v58 = vadd.f32 %v567_v56, %v561_v55 }
 0x10e   : > { %v569_v60 = vadd.f32 %v568_v58, %v562_v57 }
 0x110   : > { %v570_v61 = vadd.f32 %v569_v60, %v563_v59 }
 0x112   : > { %v571_v63 = vadd.f32 %v570_v61, %v564_v62 }
 0x114   : > { %v572_v0 = vrot.slane %v571_v63, 4 }
 0x116   : > { %v573_v1 = vadd.f32 %v572_v0, %v571_v63 }
 0x118   : > { %v574_v2 = vrot.slane %v573_v1, 2 }
 0x11a   : > { %v575_v3 = vadd.f32 %v574_v2, %v573_v1 }
 0x11c   : > { %v576_v4 = vrot.slane %v575_v3, 1 }
 0x11e   : > { %v577_v5 = vadd.f32 %v576_v4, %v575_v3 }
 0x120   : > { %v578_v6 = vmul.f32 0.015625, %v577_v5 }
 0x122   : > { %v579_v7 = vsub.f32 %v557_v37, %v578_v6  ;;  %v580_v8 = vsub.f32 %v558_v38, %v578_v6  ;;  %v581_v9 = vsub.f32 %v559_v50, %v578_v6  ;;  %v582_v10 = vsub.f32 %v560_v54, %v578_v6 }
 0x123   : > { %v583_v11 = vsub.f32 %v561_v55, %v578_v6  ;;  %v584_v12 = vsub.f32 %v562_v57, %v578_v6  ;;  %v585_v13 = vsub.f32 %v563_v59, %v578_v6  ;;  %v586_v14 = vsub.f32 %v564_v62, %v578_v6 }
 0x124   : > { %v587_v15 = vmul.f32 %v579_v7, %v579_v7  ;;  %v588_v16 = vmul.f32 %v580_v8, %v580_v8  ;;  %v589_v17 = vmul.f32 %v581_v9, %v581_v9  ;;  %v590_v19 = vmul.f32 %v582_v10, %v582_v10 }
 0x125   : > { %v591_v21 = vmul.f32 %v583_v11, %v583_v11  ;;  %v592_v23 = vmul.f32 %v584_v12, %v584_v12  ;;  %v593_v25 = vmul.f32 %v585_v13, %v585_v13  ;;  %v594_v27 = vmul.f32 %v586_v14, %v586_v14 }
 0x126   : > { %v595_v18 = vadd.f32 %v588_v16, %v587_v15 }
 0x128   : > { %v596_v20 = vadd.f32 %v595_v18, %v589_v17 }
 0x12a   : > { %v597_v22 = vadd.f32 %v596_v20, %v590_v19 }
 0x12c   : > { %v598_v24 = vadd.f32 %v597_v22, %v591_v21 }
 0x12e   : > { %v599_v26 = vadd.f32 %v598_v24, %v592_v23 }
 0x130   : > { %v600_v28 = vadd.f32 %v599_v26, %v593_v25 }
 0x132   : > { %v601_v29 = vadd.f32 %v600_v28, %v594_v27 }
 0x134   : > { %v602_v30 = vrot.slane %v601_v29, 4 }
 0x136   : > { %v603_v31 = vadd.f32 %v602_v30, %v601_v29 }
 0x138   : > { %v604_v32 = vrot.slane %v603_v31, 2 }
 0x13a   : > { %v605_v33 = vadd.f32 %v604_v32, %v603_v31 }
 0x13c   : > { %v606_v34 = vrot.slane %v605_v33, 1 }
 0x13e   : > { %v607_v35 = vadd.f32 %v606_v34, %v605_v33 }
 0x140   : > { %v608_v36 = vmul.f32 0.015625, %v607_v35 }
 0x142   : > { %v609_v37 = vadd.f32 1e-05, %v608_v36 }
 0x144   : > { %987 = vrsqrt.f32 %v609_v37 }
 0x14e   : > { %v988_v38 = vpop.eup %987 }
 0x14f   : > { %v611_v39 = vmul.f32 %v988_v38, %v579_v7  ;;  %v612_v40 = vmul.f32 %v988_v38, %v580_v8  ;;  %v613_v41 = vmul.f32 %v988_v38, %v581_v9  ;;  %v614_v42 = vmul.f32 %v988_v38, %v582_v10 }
 0x150   : > { %v615_v43 = vmul.f32 %v988_v38, %v583_v11  ;;  %v616_v44 = vmul.f32 %v988_v38, %v584_v12  ;;  %v617_v45 = vmul.f32 %v988_v38, %v585_v13  ;;  %v618_v46 = vmul.f32 %v988_v38, %v586_v14 }
 0x151   : > { %vm619_vm0 = vcmp.gt.f32.partialorder %v611_v39, 0.0  ;;  %vm620_vm1 = vcmp.gt.f32.partialorder %v612_v40, 0.0  ;;  %vm621_vm2 = vcmp.gt.f32.partialorder %v613_v41, 0.0  ;;  %vm622_vm3 = vcmp.gt.f32.partialorder %v614_v42, 0.0 }
 0x152   : > { %vm623_vm4 = vcmp.gt.f32.partialorder %v615_v43, 0.0  ;;  %vm624_vm5 = vcmp.gt.f32.partialorder %v616_v44, 0.0  ;;  %vm625_vm6 = vcmp.gt.f32.partialorder %v617_v45, 0.0  ;;  %vm626_vm7 = vcmp.gt.f32.partialorder %v618_v46, 0.0 }
 0x153   : > { %v627_v47 = vmul.f32 0.2, %v611_v39  ;;  %v628_v48 = vmul.f32 0.2, %v612_v40  ;;  %v629_v49 = vmul.f32 0.2, %v613_v41 }
 0x154   : > { %v630_v50 = vmul.f32 0.2, %v614_v42  ;;  %v631_v51 = vmul.f32 0.2, %v615_v43  ;;  %v632_v52 = vmul.f32 0.2, %v616_v44 }
 0x155   : > { %v633_v53 = vmul.f32 0.2, %v617_v45  ;;  %v634_v54 = vmul.f32 0.2, %v618_v46  ;;  %v635_v55 = vsel %vm619_vm0, %v611_v39, %v627_v47  ;;  %v636_v56 = vsel %vm620_vm1, %v612_v40, %v628_v48 }
 0x156   : > { %v637_v57 = vsel %vm621_vm2, %v613_v41, %v629_v49  ;;  %v638_v58 = vsel %vm622_vm3, %v614_v42, %v630_v50  ;;  %v639_v59 = vsel %vm623_vm4, %v615_v43, %v631_v51  ;;  %v640_v60 = vsel %vm624_vm5, %v616_v44, %v632_v52 }
 0x157   : > { %v641_v61 = vsel %vm625_vm6, %v617_v45, %v633_v53  ;;  %v642_v62 = vsel %vm626_vm7, %v618_v46, %v634_v54  ;;  %v859_v63 = vpack.c.bf16 %v636_v56, %v635_v55  ;;  %v864_v0 = vpack.c.bf16 %v638_v58, %v637_v57 }
 0x158   : > { %v869_v1 = vpack.c.bf16 %v640_v60, %v639_v59  ;;  %v874_v2 = vpack.c.bf16 %v642_v62, %v641_v61 }
 0x159   : > { %860 = vst [vmem:[%s260_s12] sm:$0xff] %v859_v63   ;;  %876 = vst [vmem:[%s260_s12 + $0x8] sm:$0xff] %v864_v0  }
 0x15a   : > { %877 = vst [vmem:[%s260_s12 + $0x10] sm:$0xff] %v869_v1   ;;  %878 = vst [vmem:[%s260_s12 + $0x18] sm:$0xff] %v874_v2  }
 0x15b PF: > { %s13_s14 = sadd.s32 1, %s1011_s14   ;;  %s1143_s12 = smov %s1007_s13 }
 0x15c   : > { %p10_p5 = scmp.ge.s32.totalorder %s13_s14, 4   ;;  %s1144_s13 = smov %s1146_s15 }
 0x15e   :  { %12 = sbr.rel (!%p10_p5) target bundleno = 2 (0x2), region = 76 }

// kernel: discriminator_forward.7
= control target key start
LH: loop header
LB: loop body
LE: loop exit
PB: predicated region body
PF: predicated region fallthrough
CT: control target
= control target key end

     0   :  { %s1102_s20 = smov 0   ;;  %s1104_s21 = smov 0   ;;  %s1245_s0 = inlined_call_operand.vmem [shape: bf16[2,16,512], index: 0, kind: input, shape index: {}]   ;;  %s1246_s1 = inlined_call_operand.vmem [shape: bf16[512,128], index: 1, kind: input, shape index: {}]   ;;  %s1247_s2 = inlined_call_operand.vmem [shape: f32[1,128], index: 2, kind: input, shape index: {}]   ;;  %s1248_s3 = inlined_call_operand.vmem [shape: f32[1,128], index: 3, kind: input, shape index: {}]   ;;  %s1249_s4 = inlined_call_operand.<no memory space> [shape: f32[1,1], index: 4, kind: input, shape index: {}]   ;;  %s1250_s5 = inlined_call_operand.vmem [shape: f32[2,16,1], index: 5, kind: output, shape index: {}]  }
   0x1   :  { %v10_v0 = vstv %s1249_s4  ;;  %s1106_s22 = smov 0  }
   0x2   :  { %11 = vst [vmem:[#allocation3] sm:$0x1] %v10_v0 }
   0x3 LB: > { %s36_s4 = sadd.s32 1, %s1063_s21  ;;  %p889_p0 = scmp.ge.s32.totalorder %s1067_s22, 1  ;;  %s1067_s22 = sphi %s1106_s22, %s17_s22   ;;  %s1063_s21 = sphi %s1104_s21, %s1252_s21   ;;  %s1059_s20 = sphi %s1102_s20, %s1251_s20  }
   0x4   : > { %p38_p1 = scmp.ge.s32.totalorder %s36_s4, 2  ;;  %p247_p2 = scmp.lt.s32.totalorder %s1067_s22, 3 }
   0x6   : > { %s1254_s4 = smov (%p38_p1, %s36_s4), 0  ;;  %p248_p3 = pnand %p889_p0, %p247_p2 }
   0x7   : > { %v1005_v1 = vld [vmem:[%s1246_s1 + $0x40] sm:$0xff] (!%p248_p3)   ;;  %v1009_v5 = vld [vmem:[%s1246_s1 + $0x48] sm:$0xff] (!%p248_p3)   ;;  %v1013_v9 = vld [vmem:[%s1246_s1 + $0x50] sm:$0xff] (!%p248_p3)   ;;  %p294_p4 = scmp.lt.s32.totalorder (!%p248_p3), %s1059_s20, 1  ;;  %vm764_vm2 = vcmask (!%p248_p3), 7168  }
   0x8   : > { %251 = sbr.rel (%p248_p3) target bundleno = 468 (0x1d4), region = 40  ;;  %v1006_v2 = vld [vmem:[%s1246_s1 + $0xc0] sm:$0xff] (!%p248_p3)   ;;  %937 = vmatprep.subr.bf16.mxu0 (!%p248_p3), %v1005_v1  ;;  %v1010_v6 = vld [vmem:[%s1246_s1 + $0xc8] sm:$0xff] (!%p248_p3)   ;;  %v1014_v10 = vld [vmem:[%s1246_s1 + $0xd0] sm:$0xff] (!%p248_p3)  }
   0x9   : > { %v1007_v3 = vld [vmem:[%s1246_s1] sm:$0xff] (!%p248_p3)   ;;  %959 = vmatprep.subr.bf16.mxu1 (!%p248_p3), %v1006_v2  ;;  %v1011_v7 = vld [vmem:[%s1246_s1 + $0x8] sm:$0xff] (!%p248_p3)   ;;  %v1015_v11 = vld [vmem:[%s1246_s1 + $0x10] sm:$0xff] (!%p248_p3)  }
   0xa   : > { %v1008_v4 = vld [vmem:[%s1246_s1 + $0x80] sm:$0xff] (!%p248_p3)   ;;  %938 = vmatpush3.bf16.msra.mxu0 (!%p248_p3), %v1007_v3  ;;  %v1012_v8 = vld [vmem:[%s1246_s1 + $0x88] sm:$0xff] (!%p248_p3)   ;;  %v1016_v12 = vld [vmem:[%s1246_s1 + $0x90] sm:$0xff] (!%p248_p3)  }
   0xb   : > { %960 = vmatpush3.bf16.msra.mxu1 (!%p248_p3), %v1008_v4  ;;  %939 = vmatprep.subr.bf16.mxu0 (!%p248_p3), %v1009_v5  ;;  %v1017_v13 = vld [vmem:[%s1246_s1 + $0x58] sm:$0xff] (!%p248_p3)   ;;  %v1021_v17 = vld [vmem:[%s1246_s1 + $0x60] sm:$0xff] (!%p248_p3)   ;;  %v1025_v21 = vld [vmem:[%s1246_s1 + $0x68] sm:$0xff] (!%p248_p3)  }
   0xc   : > { %961 = vmatprep.subr.bf16.mxu1 (!%p248_p3), %v1010_v6  ;;  %v1018_v14 = vld [vmem:[%s1246_s1 + $0xd8] sm:$0xff] (!%p248_p3)   ;;  %v1022_v18 = vld [vmem:[%s1246_s1 + $0xe0] sm:$0xff] (!%p248_p3)   ;;  %v1026_v22 = vld [vmem:[%s1246_s1 + $0xe8] sm:$0xff] (!%p248_p3)  }
   0xd   : > { %v1019_v15 = vld [vmem:[%s1246_s1 + $0x18] sm:$0xff] (!%p248_p3)   ;;  %v1023_v19 = vld [vmem:[%s1246_s1 + $0x20] sm:$0xff] (!%p248_p3)   ;;  %v1027_v23 = vld [vmem:[%s1246_s1 + $0x28] sm:$0xff] (!%p248_p3)  }
   0xe   : > { %940 = vmatpush3.bf16.msra.mxu0 (!%p248_p3), %v1011_v7  ;;  %v1020_v16 = vld [vmem:[%s1246_s1 + $0x98] sm:$0xff] (!%p248_p3)   ;;  %v1024_v20 = vld [vmem:[%s1246_s1 + $0xa0] sm:$0xff] (!%p248_p3)   ;;  %v1028_v24 = vld [vmem:[%s1246_s1 + $0xa8] sm:$0xff] (!%p248_p3)  }
   0xf   : > { %962 = vmatpush3.bf16.msra.mxu1 %v1012_v8  ;;  %941 = vmatprep.subr.bf16.mxu0 %v1013_v9  ;;  %s1256_s20 = smov (!%p294_p4, %s1059_s20), 1  ;;  %v1029_v25 = vld [vmem:[%s1246_s1 + $0x70] sm:$0xff]   ;;  %v1033_v29 = vld [vmem:[%s1246_s1 + $0x78] sm:$0xff]   ;;  %v930_v50 = vld [vmem:[%s1247_s2] ss:$0 sm:$0xff] }
  0x10   : > { %963 = vmatprep.subr.bf16.mxu1 %v1014_v10  ;;  %v1030_v26 = vld [vmem:[%s1246_s1 + $0xf0] sm:$0xff]   ;;  %s935_s8 = sshll.u32 %s1256_s20, 5  ;;  %v1034_v30 = vld [vmem:[%s1246_s1 + $0xf8] sm:$0xff]   ;;  %s936_s29 = sshll.u32 %s1256_s20, 4 }
  0x11   : > { %v1031_v27 = vld [vmem:[%s1246_s1 + $0x30] sm:$0xff]   ;;  %s301_s17 = scalar_lea.vmem %s1245_s0, %s935_s8  ;;  %v1035_v31 = vld [vmem:[%s1246_s1 + $0x38] sm:$0xff]   ;;  %s322_s7 = scalar_lea.vmem %s1250_s5, %s936_s29 }
  0x12   : > { %942 = vmatpush3.bf16.msra.mxu0 %v1015_v11  ;;  %v1032_v28 = vld [vmem:[%s1246_s1 + $0xb0] sm:$0xff]   ;;  %v1036_v32 = vld [vmem:[%s1246_s1 + $0xb8] sm:$0xff]  }
  0x13   : > { %964 = vmatpush3.bf16.msra.mxu1 %v1016_v12  ;;  %943 = vmatprep.subr.bf16.mxu0 %v1017_v13  ;;  %v1037_v33 = vld [vmem:[%s301_s17] ss:$16 sps:$4 sm:$0xff]   ;;  %v1039_v34 = vld [vmem:[%s301_s17 + $0x4] ss:$16 sps:$4 sm:$0xff]   ;;  %v1040_v35 = vld [vmem:[%s301_s17 + $0x8] ss:$16 sps:$4 sm:$0xff]  }
  0x14   : > { %965 = vmatprep.subr.bf16.mxu1 %v1018_v14  ;;  %v1042_v36 = vld [vmem:[%s301_s17 + $0xc] ss:$16 sps:$4 sm:$0xff]   ;;  %644 = vmatprep.mubr.bf16.mxu0 %v1039_v34  ;;  %v931_v14 = vld [vmem:[%s1248_s3] ss:$0 sm:$0xff] }
  0x15   : > { %685 = vmatprep.mubr.bf16.mxu1 %v1042_v36 }
  0x16   : > { %944 = vmatpush3.bf16.msra.mxu0 %v1019_v15 }
  0x17   : > { %966 = vmatpush3.bf16.msra.mxu1 %v1020_v16  ;;  %945 = vmatprep.subr.bf16.mxu0 %v1021_v17 }
  0x18   : > { %967 = vmatprep.subr.bf16.mxu1 %v1022_v18 }
  0x1a   : > { %946 = vmatpush3.bf16.msra.mxu0 %v1023_v19 }
  0x1b   : > { %968 = vmatpush3.bf16.msra.mxu1 %v1024_v20  ;;  %947 = vmatprep.subr.bf16.mxu0 %v1025_v21  ;;  %v932_v21 = vld [vmem:[#allocation3] ss:$0 sm:$0xff] }
  0x1c   : > { %969 = vmatprep.subr.bf16.mxu1 %v1026_v22 }
  0x1e   : > { %948 = vmatpush3.bf16.msra.mxu0 %v1027_v23 }
  0x1f   : > { %970 = vmatpush3.bf16.msra.mxu1 %v1028_v24  ;;  %949 = vmatprep.subr.bf16.mxu0 %v1029_v25 }
  0x20   : > { %971 = vmatprep.subr.bf16.mxu1 %v1030_v26 }
  0x22   : > { %950 = vmatpush3.bf16.msra.mxu0 %v1031_v27 }
  0x23   : > { %972 = vmatpush3.bf16.msra.mxu1 %v1032_v28  ;;  %951 = vmatprep.subr.bf16.mxu0 %v1033_v29 }
  0x24   : > { %973 = vmatprep.subr.bf16.mxu1 %v1034_v30 }
  0x26   : > { %952 = vmatpush3.bf16.msra.mxu0 %v1035_v31 }
  0x27   : > { %974 = vmatpush3.bf16.msra.mxu1 %v1036_v32 }
  0x29   : > { %645 = vmatmul.mubr.bf16.vlgmr.msra.gmra.mrb[0].mxu0 %v1037_v33 }
  0x2a   : > { %686 = vmatmul.mubr.bf16.vlgmr.msra.gmra.mrb[0].mxu1 %v1040_v35 }
  0xfc   : > { %v953_v37 = vpop.f32.mrb[0].mxu0 }
  0xfd   : > { %v975_v38 = vpop.f32.mrb[0].mxu1  ;;  %v954_v39 = vpop.f32.mrb[1].mxu0 }
  0xfe   : > { %v955_v40 = vadd.f32 %v954_v39, %v953_v37  ;;  %v976_v41 = vpop.f32.mrb[1].mxu1  ;;  %v956_v42 = vpop.f32.mrb[2].mxu0 }
  0xff   : > { %v977_v43 = vadd.f32 %v976_v41, %v975_v38  ;;  %v978_v44 = vpop.f32.mrb[2].mxu1  ;;  %v957_v45 = vpop.f32.mrb[3].mxu0 }
 0x100   : > { %v958_v46 = vadd.f32 %v957_v45, %v956_v42  ;;  %v979_v47 = vpop.f32.mrb[3].mxu1 }
 0x101   : > { %v688_v48 = vadd.f32 %v977_v43, %v955_v40  ;;  %v980_v49 = vadd.f32 %v979_v47, %v978_v44 }
 0x103   : > { %v691_v51 = vadd.f32 %v980_v49, %v958_v46  ;;  %v710_v52 = vadd.f32 %v930_v50, %v688_v48 }
 0x105   : > { %v711_v53 = vadd.f32 %v930_v50, %v691_v51 }
 0x107   : > { %v712_v54 = vadd.f32 %v711_v53, %v710_v52 }
 0x109   : > { %v713_v55 = vrot.slane %v712_v54, 4 }
 0x10b   : > { %v714_v56 = vadd.f32 %v713_v55, %v712_v54 }
 0x10d   : > { %v715_v57 = vrot.slane %v714_v56, 2 }
 0x10f   : > { %v716_v58 = vadd.f32 %v715_v57, %v714_v56 }
 0x111   : > { %v717_v59 = vrot.slane %v716_v58, 1 }
 0x113   : > { %v718_v60 = vadd.f32 %v717_v59, %v716_v58 }
 0x115   : > { %v719_v61 = vmul.f32 0.0625, %v718_v60 }
 0x117   : > { %v721_v62 = vsub.f32 %v711_v53, %v719_v61  ;;  %v720_v63 = vsub.f32 %v710_v52, %v719_v61 }
 0x119   : > { %v723_v0 = vmul.f32 %v721_v62, %v721_v62  ;;  %v722_v1 = vmul.f32 %v720_v63, %v720_v63 }
 0x11b   : > { %v724_v2 = vadd.f32 %v723_v0, %v722_v1 }
 0x11d   : > { %v725_v3 = vrot.slane %v724_v2, 4 }
 0x11f   : > { %v726_v4 = vadd.f32 %v725_v3, %v724_v2 }
 0x121   : > { %v727_v5 = vrot.slane %v726_v4, 2 }
 0x123   : > { %v728_v6 = vadd.f32 %v727_v5, %v726_v4 }
 0x125   : > { %v729_v7 = vrot.slane %v728_v6, 1 }
 0x127   : > { %v730_v8 = vadd.f32 %v729_v7, %v728_v6 }
 0x129   : > { %v731_v9 = vmul.f32 0.0625, %v730_v8 }
 0x12b   : > { %v732_v10 = vadd.f32 1e-05, %v731_v9 }
 0x12d   : > { %1043 = vrsqrt.f32 %v732_v10 }
 0x137   : > { %v1044_v11 = vpop.eup %1043 }
 0x138   : > { %v734_v12 = vmul.f32 %v1044_v11, %v720_v63  ;;  %v735_v13 = vmul.f32 %v1044_v11, %v721_v62 }
 0x13a   : > { %vm736_vm0 = vcmp.gt.f32.partialorder %v734_v12, 0.0  ;;  %v738_v15 = vmul.f32 0.2, %v734_v12  ;;  %v739_v16 = vmul.f32 0.2, %v735_v13  ;;  %vm737_vm1 = vcmp.gt.f32.partialorder %v735_v13, 0.0 }
 0x13c   : > { %v740_v17 = vsel %vm736_vm0, %v734_v12, %v738_v15  ;;  %v741_v19 = vsel %vm737_vm1, %v735_v13, %v739_v16 }
 0x13d   : > { %v749_v18 = vmul.f32 %v931_v14, %v740_v17  ;;  %v750_v20 = vmul.f32 %v931_v14, %v741_v19 }
 0x13f   : > { %751 = vadd.xlane.f32.xlu0 %v749_v18 }
 0x143   : > { %753 = vadd.xlane.f32.xlu0 %v750_v20 }
 0x1cc   : > { %v752_v22 = vpop.xlane.xlu0 %751 }
 0x1cd   : > { %v762_v23 = vadd.f32 %v932_v21, %v752_v22 }
 0x1cf   : > { %765 = vst.msk [vmem:[%s322_s7] sm:$0xff] %vm764_vm2, %v762_v23 }
 0x1d0   : > { %v754_v24 = vpop.xlane.xlu0 %753 }
 0x1d1   : > { %v763_v25 = vadd.f32 %v932_v21, %v754_v24 }
 0x1d3   : > { %766 = vst.msk [vmem:[%s322_s7 + $0x8] sm:$0xff] %vm764_vm2, %v763_v25 }
 0x1d4 PF: > { %s17_s22 = sadd.s32 1, %s1067_s22   ;;  %s1251_s20 = smov %s1063_s21 }
 0x1d5   : > { %p14_p5 = scmp.ge.s32.totalorder %s17_s22, 4   ;;  %s1252_s21 = smov %s1254_s4 }
 0x1d7   :  { %16 = sbr.rel (!%p14_p5) target bundleno = 3 (0x3), region = 87 }

</bundles_post_ra>
